<compile_context>
chip_gen: v5e
topology: v5e:2x2
jax: 0.10.0
libtpu: 0.0.40
codegen_flags: <defaults>
</compile_context>

<pallas_src>
import math

import jax
import jax.numpy as jnp
import numpy as np
from jax import lax
from jax.experimental import pallas as pl
from jax.experimental.pallas import tpu as pltpu

# -------------------------------------------------------------------------
# static configuration
# -------------------------------------------------------------------------
D_NUMERICAL = 4
D_TOKEN = 32
N_HEADS = 4
D_HEAD = D_TOKEN // N_HEADS
N_LAYERS = 2
D_FFN_FACTOR = 2.0
D_HIDDEN = int(D_TOKEN * D_FFN_FACTOR)     # 64
D_OUT = 1
N_TOKENS = D_NUMERICAL + 1                 # [CLS] + numeric features
PRENORM = True
LN_EPS = 1e-5
BATCH = 8
NEG_BIG = -1e30

# TODO(synk): categorical-feature embeddings (x_cat path), kv_compression and train-mode
# dropout are omitted; this config uses categories=None, kv_compression=None, dropout=0 (eval).


def _layer_norm(x, gamma, beta):
    """PyTorch nn.LayerNorm over the last axis (biased variance)."""
    mu = jnp.mean(x, axis=-1, keepdims=True)
    xc = x - mu
    var = jnp.mean(xc * xc, axis=-1, keepdims=True)
    return xc * lax.rsqrt(var + LN_EPS) * gamma + beta


# -------------------------------------------------------------------------
# fused Pallas kernel: tokenizer -> 2 transformer blocks -> head
# -------------------------------------------------------------------------
def fused_forward_kernel(
    xaug_ref, tokw_ref, tokb_ref, attn_bias_ref, bias_cls_ref, sel_ref,
    n0g_ref, n0b_ref, wqkv_ref, bqkv_ref, wo_ref, bo_ref,
    n1g_ref, n1b_ref, w0_ref, b0_ref, w1_ref, b1_ref,
    lng_ref, lnb_ref, headw_ref, headb_ref,
    out_ref,
):
    f32 = jnp.float32
    D = D_TOKEN

    # ---- tokenizer: x[r] = xaug[r] * W_tok[r % T] + b_tok[r % T] (weights pre-tiled) ----
    x = xaug_ref[...] * tokw_ref[...] + tokb_ref[...]          # (R, D), R = B*T

    lane = lax.broadcasted_iota(jnp.int32, (1, D), 1)
    head_masks = [
        ((lane >= h * D_HEAD) & (lane < (h + 1) * D_HEAD)).astype(f32)
        for h in range(N_HEADS)
    ]
    scale = 1.0 / math.sqrt(D_HEAD)
    sel = sel_ref[...]                                          # (B, R) one-hot [CLS] selector

    for li in range(N_LAYERS):                                  # static unroll, weights resident
        is_last = li == N_LAYERS - 1

        # ---- attention sub-block (prenorm: layer 0 has no norm0) ----
        xr = x if (PRENORM and li == 0) else _layer_norm(x, n0g_ref[li], n0b_ref[li])
        qkv = jnp.dot(xr, wqkv_ref[li], preferred_element_type=f32) + bqkv_ref[li]   # (R, 3D)
        q = qkv[:, :D] * scale
        k = qkv[:, D:2 * D]
        v = qkv[:, 2 * D:]

        if is_last:
            # PyTorch: last layer only queries the [CLS] token; residual base is x[:, :1].
            q = jnp.dot(sel, q, preferred_element_type=f32)     # (B, D)
            x = jnp.dot(sel, x, preferred_element_type=f32)     # (B, D) residual base
            bias = bias_cls_ref[...]                            # (B, R)
        else:
            bias = attn_bias_ref[...]                           # (R, R) block-diagonal mask

        attn = None
        for hm in head_masks:
            # masking q zeroes the other heads' lanes in the contraction -> per-head scores
            s = lax.dot_general(q * hm, k, (((1,), (1,)), ((), ())),
                                preferred_element_type=f32)     # (rows, R)
            s = s + bias                                        # restrict to own sample
            s = s - jnp.max(s, axis=-1, keepdims=True)
            p = jnp.exp(s)
            p = p * pl.reciprocal(jnp.sum(p, axis=-1, keepdims=True), approx=True)
            o = jnp.dot(p, v * hm, preferred_element_type=f32)  # non-zero only in head-h lanes
            attn = o if attn is None else attn + o
        attn = jnp.dot(attn, wo_ref[li], preferred_element_type=f32) + bo_ref[li]
        x = x + attn                                            # residual (prenorm)

        # ---- FFN sub-block (reglu) ----
        xr2 = _layer_norm(x, n1g_ref[li], n1b_ref[li])
        h0 = jnp.dot(xr2, w0_ref[li], preferred_element_type=f32) + b0_ref[li]       # (rows, 2H)
        a = h0[:, :D_HIDDEN]
        g = h0[:, D_HIDDEN:]
        h1 = jnp.dot(a * jnp.maximum(g, 0.0), w1_ref[li], preferred_element_type=f32) + b1_ref[li]
        x = x + h1

    # ---- head: LN, ReLU, Linear on the (B, D) [CLS] slab ----
    xh = _layer_norm(x, lng_ref[...], lnb_ref[...])
    xh = jnp.maximum(xh, 0.0)
    out = jnp.dot(xh, headw_ref[...], preferred_element_type=f32) + headb_ref[...]
    out_ref[...] = out.astype(out_ref.dtype)


# -------------------------------------------------------------------------
# parameter packing (done once) + jitted wrapper around the single pallas_call
# -------------------------------------------------------------------------
def pack_params(params, batch):
    T = N_TOKENS
    R = batch * T
    tokb_full = jnp.concatenate(
        [jnp.zeros((1, D_TOKEN), jnp.float32), params["tok_bias"]], axis=0)          # (T, D)

    bid = np.arange(R) // T
    attn_bias = np.where(bid[:, None] == bid[None, :], 0.0, NEG_BIG).astype(np.float32)
    bias_cls = attn_bias[np.arange(batch) * T]                                        # (B, R)
    sel = np.zeros((batch, R), np.float32)
    sel[np.arange(batch), np.arange(batch) * T] = 1.0

    def stack(fn):
        return jnp.stack([fn(p) for p in params["layers"]], axis=0)

    return {
        "tokw_t": jnp.tile(params["tok_weight"], (batch, 1)),                        # (R, D)
        "tokb_t": jnp.tile(tokb_full, (batch, 1)),                                   # (R, D)
        "attn_bias": jnp.asarray(attn_bias),                                         # (R, R)
        "bias_cls": jnp.asarray(bias_cls),                                           # (B, R)
        "sel": jnp.asarray(sel),                                                     # (B, R)
        "n0g": stack(lambda p: p["n0g"]), "n0b": stack(lambda p: p["n0b"]),          # (L,1,D)
        "wqkv": stack(lambda p: jnp.concatenate([p["wq"], p["wk"], p["wv"]], axis=1)),  # (L,D,3D)
        "bqkv": stack(lambda p: jnp.concatenate([p["bq"], p["bk"], p["bv"]], axis=1)),  # (L,1,3D)
        "wo": stack(lambda p: p["wo"]), "bo": stack(lambda p: p["bo"]),
        "n1g": stack(lambda p: p["n1g"]), "n1b": stack(lambda p: p["n1b"]),
        "w0": stack(lambda p: p["w0"]), "b0": stack(lambda p: p["b0"]),
        "w1": stack(lambda p: p["w1"]), "b1": stack(lambda p: p["b1"]),
        "lng": params["lng"], "lnb": params["lnb"],
        "head_w": params["head_w"], "head_b": params["head_b"],
    }


@jax.jit
def transformer_forward(x_num, packed):
    B = x_num.shape[0]
    xaug = jnp.concatenate(
        [jnp.ones((B, 1), jnp.float32), x_num.astype(jnp.float32)], axis=1)          # (B, T)
    xaug_flat = xaug.reshape(B * N_TOKENS, 1)

    out = pl.pallas_call(
        fused_forward_kernel,
        out_shape=jax.ShapeDtypeStruct((B, D_OUT), jnp.float32),
        in_specs=[pl.BlockSpec(memory_space=pltpu.MemorySpace.VMEM)] * 22,
        out_specs=pl.BlockSpec(memory_space=pltpu.MemorySpace.VMEM),
    )(
        xaug_flat, packed["tokw_t"], packed["tokb_t"],
        packed["attn_bias"], packed["bias_cls"], packed["sel"],
        packed["n0g"], packed["n0b"], packed["wqkv"], packed["bqkv"],
        packed["wo"], packed["bo"], packed["n1g"], packed["n1b"],
        packed["w0"], packed["b0"], packed["w1"], packed["b1"],
        packed["lng"], packed["lnb"], packed["head_w"], packed["head_b"],
    )
    return out[:, 0]                                                                 # (B,)


# -------------------------------------------------------------------------
# Pure-JAX reference (same math as the PyTorch module) for a correctness check
# -------------------------------------------------------------------------
def reference_forward(x_num, params):
    B = x_num.shape[0]
    x_aug = jnp.concatenate([jnp.ones((B, 1), jnp.float32), x_num], axis=1)
    tok_b_full = jnp.concatenate(
        [jnp.zeros((1, D_TOKEN), jnp.float32), params["tok_bias"]], axis=0)
    x = x_aug[:, :, None] * params["tok_weight"][None] + tok_b_full[None]

    for li in range(N_LAYERS):
        p = params["layers"][li]
        is_last = li == N_LAYERS - 1
        has_norm0 = li > 0
        xr = _layer_norm(x, p["n0g"], p["n0b"]) if has_norm0 else x
        xq = xr[:, :1] if is_last else xr
        q = xq @ p["wq"] + p["bq"]
        k = xr @ p["wk"] + p["bk"]
        v = xr @ p["wv"] + p["bv"]

        def split_heads(t):
            b, n, _ = t.shape
            return t.reshape(b, n, N_HEADS, D_HEAD).transpose(0, 2, 1, 3)

        qh, kh, vh = split_heads(q), split_heads(k), split_heads(v)
        s = jnp.einsum("bhqd,bhkd->bhqk", qh, kh) / math.sqrt(D_HEAD)
        s = s - jnp.max(s, axis=-1, keepdims=True)
        pa = jnp.exp(s)
        pa = pa / jnp.sum(pa, axis=-1, keepdims=True)
        o = jnp.einsum("bhqk,bhkd->bhqd", pa, vh)
        o = o.transpose(0, 2, 1, 3).reshape(q.shape[0], q.shape[1], D_TOKEN)
        o = o @ p["wo"] + p["bo"]

        x_base = x[:, :1] if is_last else x
        x1 = x_base + o
        xr2 = _layer_norm(x1, p["n1g"], p["n1b"])
        h0 = xr2 @ p["w0"] + p["b0"]
        a, g = h0[..., :D_HIDDEN], h0[..., D_HIDDEN:]
        x = x1 + (a * jnp.maximum(g, 0.0)) @ p["w1"] + p["b1"]

    x = x[:, 0]
    x = _layer_norm(x, params["lng"], params["lnb"])
    x = jnp.maximum(x, 0.0)
    x = x @ params["head_w"] + params["head_b"]
    return x[:, 0]


# -------------------------------------------------------------------------
# deterministic parameter construction
# -------------------------------------------------------------------------
def init_params(key):
    def nrm(k, shape, scale=0.1):
        return (scale * jax.random.normal(k, shape)).astype(jnp.float32)

    keys = iter(jax.random.split(key, 64))
    params = {
        "tok_weight": nrm(next(keys), (N_TOKENS, D_TOKEN)),
        "tok_bias": nrm(next(keys), (D_NUMERICAL, D_TOKEN)),
        "lng": jnp.ones((1, D_TOKEN), jnp.float32),
        "lnb": jnp.zeros((1, D_TOKEN), jnp.float32),
        "head_w": nrm(next(keys), (D_TOKEN, D_OUT)),
        "head_b": nrm(next(keys), (1, D_OUT)),
        "layers": [],
    }
    for _ in range(N_LAYERS):
        lp = {
            "n0g": jnp.ones((1, D_TOKEN), jnp.float32),
            "n0b": jnp.zeros((1, D_TOKEN), jnp.float32),
            "wq": nrm(next(keys), (D_TOKEN, D_TOKEN)),
            "bq": jnp.zeros((1, D_TOKEN), jnp.float32),    # zero-init per module
            "wk": nrm(next(keys), (D_TOKEN, D_TOKEN)),
            "bk": jnp.zeros((1, D_TOKEN), jnp.float32),
            "wv": nrm(next(keys), (D_TOKEN, D_TOKEN)),
            "bv": jnp.zeros((1, D_TOKEN), jnp.float32),
            "wo": nrm(next(keys), (D_TOKEN, D_TOKEN)),
            "bo": jnp.zeros((1, D_TOKEN), jnp.float32),
            "n1g": jnp.ones((1, D_TOKEN), jnp.float32),
            "n1b": jnp.zeros((1, D_TOKEN), jnp.float32),
            "w0": nrm(next(keys), (D_TOKEN, 2 * D_HIDDEN)),  # reglu -> 2 * d_hidden
            "b0": nrm(next(keys), (1, 2 * D_HIDDEN)),
            "w1": nrm(next(keys), (D_HIDDEN, D_TOKEN)),
            "b1": nrm(next(keys), (1, D_TOKEN)),
        }
        params["layers"].append(lp)
    return params


if __name__ == "__main__":
    key = jax.random.PRNGKey(0)
    pkey, xkey = jax.random.split(key)
    params = init_params(pkey)
    packed = pack_params(params, BATCH)
    x_num = jax.random.normal(xkey, (BATCH, D_NUMERICAL), jnp.float32)

    out = transformer_forward(x_num, packed)
    out = jax.block_until_ready(out)

    ref = reference_forward(x_num, params)
    err = float(jnp.max(jnp.abs(out - ref)))
    assert out.shape == (BATCH,), out.shape
    # 2e-3 tolerance: pl.reciprocal(approx=True) in the softmax denominator is not bit-exact.
    assert err < 2e-3, f"mismatch vs pure-JAX reference: {err}"
    print("KERNEL_OK")
</pallas_src>

<mosaic_0001>
module attributes {stable_mosaic.version = 11 : i64} {
  func.func @fused_forward_kernel(%arg0: memref<40x1xf32, #tpu.memory_space<vmem>>, %arg1: memref<40x32xf32, #tpu.memory_space<vmem>>, %arg2: memref<40x32xf32, #tpu.memory_space<vmem>>, %arg3: memref<40x40xf32, #tpu.memory_space<vmem>>, %arg4: memref<8x40xf32, #tpu.memory_space<vmem>>, %arg5: memref<8x40xf32, #tpu.memory_space<vmem>>, %arg6: memref<2x1x32xf32, #tpu.memory_space<vmem>>, %arg7: memref<2x1x32xf32, #tpu.memory_space<vmem>>, %arg8: memref<2x32x96xf32, #tpu.memory_space<vmem>>, %arg9: memref<2x1x96xf32, #tpu.memory_space<vmem>>, %arg10: memref<2x32x32xf32, #tpu.memory_space<vmem>>, %arg11: memref<2x1x32xf32, #tpu.memory_space<vmem>>, %arg12: memref<2x1x32xf32, #tpu.memory_space<vmem>>, %arg13: memref<2x1x32xf32, #tpu.memory_space<vmem>>, %arg14: memref<2x32x128xf32, #tpu.memory_space<vmem>>, %arg15: memref<2x1x128xf32, #tpu.memory_space<vmem>>, %arg16: memref<2x64x32xf32, #tpu.memory_space<vmem>>, %arg17: memref<2x1x32xf32, #tpu.memory_space<vmem>>, %arg18: memref<1x32xf32, #tpu.memory_space<vmem>>, %arg19: memref<1x32xf32, #tpu.memory_space<vmem>>, %arg20: memref<32x1xf32, #tpu.memory_space<vmem>>, %arg21: memref<1x1xf32, #tpu.memory_space<vmem>>, %arg22: memref<8x1xf32, #tpu.memory_space<vmem>>) attributes {dimension_semantics = [], scalar_prefetch = 0 : i64, scratch_operands = 0 : i64, tpu.core_type = #tpu.core_type<tc>} {
    %c0 = arith.constant 0 : index
    %c0_0 = arith.constant 0 : index
    %0 = vector.load %arg0[%c0, %c0_0] : memref<40x1xf32, #tpu.memory_space<vmem>>, vector<40x1xf32>
    %c0_1 = arith.constant 0 : index
    %c0_2 = arith.constant 0 : index
    %1 = vector.load %arg1[%c0_1, %c0_2] : memref<40x32xf32, #tpu.memory_space<vmem>>, vector<40x32xf32>
    %2 = vector.broadcast %0 : vector<40x1xf32> to vector<40x32xf32>
    %3 = arith.mulf %2, %1 : vector<40x32xf32>
    %c0_3 = arith.constant 0 : index
    %c0_4 = arith.constant 0 : index
    %4 = vector.load %arg2[%c0_3, %c0_4] : memref<40x32xf32, #tpu.memory_space<vmem>>, vector<40x32xf32>
    %5 = arith.addf %3, %4 : vector<40x32xf32>
    %6 = tpu.iota {dimensions = array<i32: 1>} : vector<1x32xi32>
    %c0_i32 = arith.constant 0 : i32
    %7 = vector.broadcast %c0_i32 : i32 to vector<1x32xi32>
    %8 = arith.cmpi sge, %6, %7 : vector<1x32xi32>
    %c8_i32 = arith.constant 8 : i32
    %9 = vector.broadcast %c8_i32 : i32 to vector<1x32xi32>
    %10 = arith.cmpi slt, %6, %9 : vector<1x32xi32>
    %11 = arith.andi %8, %10 : vector<1x32xi1>
    %12 = arith.extui %11 : vector<1x32xi1> to vector<1x32xi32>
    %13 = arith.sitofp %12 : vector<1x32xi32> to vector<1x32xf32>
    %c8_i32_5 = arith.constant 8 : i32
    %14 = vector.broadcast %c8_i32_5 : i32 to vector<1x32xi32>
    %15 = arith.cmpi sge, %6, %14 : vector<1x32xi32>
    %c16_i32 = arith.constant 16 : i32
    %16 = vector.broadcast %c16_i32 : i32 to vector<1x32xi32>
    %17 = arith.cmpi slt, %6, %16 : vector<1x32xi32>
    %18 = arith.andi %15, %17 : vector<1x32xi1>
    %19 = arith.extui %18 : vector<1x32xi1> to vector<1x32xi32>
    %20 = arith.sitofp %19 : vector<1x32xi32> to vector<1x32xf32>
    %c16_i32_6 = arith.constant 16 : i32
    %21 = vector.broadcast %c16_i32_6 : i32 to vector<1x32xi32>
    %22 = arith.cmpi sge, %6, %21 : vector<1x32xi32>
    %c24_i32 = arith.constant 24 : i32
    %23 = vector.broadcast %c24_i32 : i32 to vector<1x32xi32>
    %24 = arith.cmpi slt, %6, %23 : vector<1x32xi32>
    %25 = arith.andi %22, %24 : vector<1x32xi1>
    %26 = arith.extui %25 : vector<1x32xi1> to vector<1x32xi32>
    %27 = arith.sitofp %26 : vector<1x32xi32> to vector<1x32xf32>
    %c24_i32_7 = arith.constant 24 : i32
    %28 = vector.broadcast %c24_i32_7 : i32 to vector<1x32xi32>
    %29 = arith.cmpi sge, %6, %28 : vector<1x32xi32>
    %c32_i32 = arith.constant 32 : i32
    %30 = vector.broadcast %c32_i32 : i32 to vector<1x32xi32>
    %31 = arith.cmpi slt, %6, %30 : vector<1x32xi32>
    %32 = arith.andi %29, %31 : vector<1x32xi1>
    %33 = arith.extui %32 : vector<1x32xi1> to vector<1x32xi32>
    %34 = arith.sitofp %33 : vector<1x32xi32> to vector<1x32xf32>
    %c0_8 = arith.constant 0 : index
    %c0_9 = arith.constant 0 : index
    %35 = vector.load %arg5[%c0_8, %c0_9] : memref<8x40xf32, #tpu.memory_space<vmem>>, vector<8x40xf32>
    %c0_10 = arith.constant 0 : index
    %c0_11 = arith.constant 0 : index
    %c0_12 = arith.constant 0 : index
    %36 = vector.load %arg8[%c0_10, %c0_11, %c0_12] : memref<2x32x96xf32, #tpu.memory_space<vmem>>, vector<1x32x96xf32>
    %37 = vector.shape_cast %36 : vector<1x32x96xf32> to vector<32x96xf32>
    %cst = arith.constant dense<0.000000e+00> : vector<40x96xf32>
    %38 = tpu.matmul %5, %37, %cst {dimension_numbers = #tpu.dot_dimension_numbers<[1], [0], [0], [1], [0, 0, 1, 1], [], []>} : vector<40x32xf32>, vector<32x96xf32>, vector<40x96xf32> -> vector<40x96xf32>
    %c0_13 = arith.constant 0 : index
    %c0_14 = arith.constant 0 : index
    %c0_15 = arith.constant 0 : index
    %39 = vector.load %arg9[%c0_13, %c0_14, %c0_15] : memref<2x1x96xf32, #tpu.memory_space<vmem>>, vector<1x1x96xf32>
    %40 = vector.shape_cast %39 : vector<1x1x96xf32> to vector<1x96xf32>
    %41 = vector.broadcast %40 : vector<1x96xf32> to vector<40x96xf32>
    %42 = arith.addf %38, %41 : vector<40x96xf32>
    %43 = vector.extract_strided_slice %42 {offsets = [0, 0], sizes = [40, 32], strides = [1, 1]} : vector<40x96xf32> to vector<40x32xf32>
    %cst_16 = arith.constant 0.353553385 : f32
    %44 = vector.broadcast %cst_16 : f32 to vector<40x32xf32>
    %45 = arith.mulf %43, %44 : vector<40x32xf32>
    %46 = vector.extract_strided_slice %42 {offsets = [0, 32], sizes = [40, 32], strides = [1, 1]} : vector<40x96xf32> to vector<40x32xf32>
    %47 = vector.extract_strided_slice %42 {offsets = [0, 64], sizes = [40, 32], strides = [1, 1]} : vector<40x96xf32> to vector<40x32xf32>
    %c0_17 = arith.constant 0 : index
    %c0_18 = arith.constant 0 : index
    %48 = vector.load %arg3[%c0_17, %c0_18] : memref<40x40xf32, #tpu.memory_space<vmem>>, vector<40x40xf32>
    %49 = vector.broadcast %13 : vector<1x32xf32> to vector<40x32xf32>
    %50 = arith.mulf %45, %49 : vector<40x32xf32>
    %cst_19 = arith.constant dense<0.000000e+00> : vector<40x40xf32>
    %51 = tpu.matmul %50, %46, %cst_19 {dimension_numbers = #tpu.dot_dimension_numbers<[1], [1], [0], [0], [0, 0, 1, 0], [], []>} : vector<40x32xf32>, vector<40x32xf32>, vector<40x40xf32> -> vector<40x40xf32>
    %52 = arith.addf %51, %48 : vector<40x40xf32>
    %cst_20 = arith.constant dense<0xFF800000> : vector<40xf32>
    %53 = vector.multi_reduction <maximumf>, %52, %cst_20 [1] : vector<40x40xf32> to vector<40xf32>
    %54 = vector.shape_cast %53 : vector<40xf32> to vector<40x1xf32>
    %55 = vector.broadcast %54 : vector<40x1xf32> to vector<40x40xf32>
    %56 = arith.subf %52, %55 : vector<40x40xf32>
    %57 = math.exp %56 : vector<40x40xf32>
    %cst_21 = arith.constant dense<0.000000e+00> : vector<40xf32>
    %58 = vector.multi_reduction <add>, %57, %cst_21 [1] : vector<40x40xf32> to vector<40xf32>
    %59 = vector.shape_cast %58 : vector<40xf32> to vector<40x1xf32>
    %60 = tpu.reciprocal %59 {approx = true} : vector<40x1xf32> -> vector<40x1xf32>
    %61 = vector.broadcast %60 : vector<40x1xf32> to vector<40x40xf32>
    %62 = arith.mulf %57, %61 : vector<40x40xf32>
    %63 = vector.broadcast %13 : vector<1x32xf32> to vector<40x32xf32>
    %64 = arith.mulf %47, %63 : vector<40x32xf32>
    %cst_22 = arith.constant dense<0.000000e+00> : vector<40x32xf32>
    %65 = tpu.matmul %62, %64, %cst_22 {dimension_numbers = #tpu.dot_dimension_numbers<[1], [0], [0], [1], [0, 0, 1, 1], [], []>} : vector<40x40xf32>, vector<40x32xf32>, vector<40x32xf32> -> vector<40x32xf32>
    %66 = vector.broadcast %20 : vector<1x32xf32> to vector<40x32xf32>
    %67 = arith.mulf %45, %66 : vector<40x32xf32>
    %cst_23 = arith.constant dense<0.000000e+00> : vector<40x40xf32>
    %68 = tpu.matmul %67, %46, %cst_23 {dimension_numbers = #tpu.dot_dimension_numbers<[1], [1], [0], [0], [0, 0, 1, 0], [], []>} : vector<40x32xf32>, vector<40x32xf32>, vector<40x40xf32> -> vector<40x40xf32>
    %69 = arith.addf %68, %48 : vector<40x40xf32>
    %cst_24 = arith.constant dense<0xFF800000> : vector<40xf32>
    %70 = vector.multi_reduction <maximumf>, %69, %cst_24 [1] : vector<40x40xf32> to vector<40xf32>
    %71 = vector.shape_cast %70 : vector<40xf32> to vector<40x1xf32>
    %72 = vector.broadcast %71 : vector<40x1xf32> to vector<40x40xf32>
    %73 = arith.subf %69, %72 : vector<40x40xf32>
    %74 = math.exp %73 : vector<40x40xf32>
    %cst_25 = arith.constant dense<0.000000e+00> : vector<40xf32>
    %75 = vector.multi_reduction <add>, %74, %cst_25 [1] : vector<40x40xf32> to vector<40xf32>
    %76 = vector.shape_cast %75 : vector<40xf32> to vector<40x1xf32>
    %77 = tpu.reciprocal %76 {approx = true} : vector<40x1xf32> -> vector<40x1xf32>
    %78 = vector.broadcast %77 : vector<40x1xf32> to vector<40x40xf32>
    %79 = arith.mulf %74, %78 : vector<40x40xf32>
    %80 = vector.broadcast %20 : vector<1x32xf32> to vector<40x32xf32>
    %81 = arith.mulf %47, %80 : vector<40x32xf32>
    %cst_26 = arith.constant dense<0.000000e+00> : vector<40x32xf32>
    %82 = tpu.matmul %79, %81, %cst_26 {dimension_numbers = #tpu.dot_dimension_numbers<[1], [0], [0], [1], [0, 0, 1, 1], [], []>} : vector<40x40xf32>, vector<40x32xf32>, vector<40x32xf32> -> vector<40x32xf32>
    %83 = arith.addf %65, %82 : vector<40x32xf32>
    %84 = vector.broadcast %27 : vector<1x32xf32> to vector<40x32xf32>
    %85 = arith.mulf %45, %84 : vector<40x32xf32>
    %cst_27 = arith.constant dense<0.000000e+00> : vector<40x40xf32>
    %86 = tpu.matmul %85, %46, %cst_27 {dimension_numbers = #tpu.dot_dimension_numbers<[1], [1], [0], [0], [0, 0, 1, 0], [], []>} : vector<40x32xf32>, vector<40x32xf32>, vector<40x40xf32> -> vector<40x40xf32>
    %87 = arith.addf %86, %48 : vector<40x40xf32>
    %cst_28 = arith.constant dense<0xFF800000> : vector<40xf32>
    %88 = vector.multi_reduction <maximumf>, %87, %cst_28 [1] : vector<40x40xf32> to vector<40xf32>
    %89 = vector.shape_cast %88 : vector<40xf32> to vector<40x1xf32>
    %90 = vector.broadcast %89 : vector<40x1xf32> to vector<40x40xf32>
    %91 = arith.subf %87, %90 : vector<40x40xf32>
    %92 = math.exp %91 : vector<40x40xf32>
    %cst_29 = arith.constant dense<0.000000e+00> : vector<40xf32>
    %93 = vector.multi_reduction <add>, %92, %cst_29 [1] : vector<40x40xf32> to vector<40xf32>
    %94 = vector.shape_cast %93 : vector<40xf32> to vector<40x1xf32>
    %95 = tpu.reciprocal %94 {approx = true} : vector<40x1xf32> -> vector<40x1xf32>
    %96 = vector.broadcast %95 : vector<40x1xf32> to vector<40x40xf32>
    %97 = arith.mulf %92, %96 : vector<40x40xf32>
    %98 = vector.broadcast %27 : vector<1x32xf32> to vector<40x32xf32>
    %99 = arith.mulf %47, %98 : vector<40x32xf32>
    %cst_30 = arith.constant dense<0.000000e+00> : vector<40x32xf32>
    %100 = tpu.matmul %97, %99, %cst_30 {dimension_numbers = #tpu.dot_dimension_numbers<[1], [0], [0], [1], [0, 0, 1, 1], [], []>} : vector<40x40xf32>, vector<40x32xf32>, vector<40x32xf32> -> vector<40x32xf32>
    %101 = arith.addf %83, %100 : vector<40x32xf32>
    %102 = vector.broadcast %34 : vector<1x32xf32> to vector<40x32xf32>
    %103 = arith.mulf %45, %102 : vector<40x32xf32>
    %cst_31 = arith.constant dense<0.000000e+00> : vector<40x40xf32>
    %104 = tpu.matmul %103, %46, %cst_31 {dimension_numbers = #tpu.dot_dimension_numbers<[1], [1], [0], [0], [0, 0, 1, 0], [], []>} : vector<40x32xf32>, vector<40x32xf32>, vector<40x40xf32> -> vector<40x40xf32>
    %105 = arith.addf %104, %48 : vector<40x40xf32>
    %cst_32 = arith.constant dense<0xFF800000> : vector<40xf32>
    %106 = vector.multi_reduction <maximumf>, %105, %cst_32 [1] : vector<40x40xf32> to vector<40xf32>
    %107 = vector.shape_cast %106 : vector<40xf32> to vector<40x1xf32>
    %108 = vector.broadcast %107 : vector<40x1xf32> to vector<40x40xf32>
    %109 = arith.subf %105, %108 : vector<40x40xf32>
    %110 = math.exp %109 : vector<40x40xf32>
    %cst_33 = arith.constant dense<0.000000e+00> : vector<40xf32>
    %111 = vector.multi_reduction <add>, %110, %cst_33 [1] : vector<40x40xf32> to vector<40xf32>
    %112 = vector.shape_cast %111 : vector<40xf32> to vector<40x1xf32>
    %113 = tpu.reciprocal %112 {approx = true} : vector<40x1xf32> -> vector<40x1xf32>
    %114 = vector.broadcast %113 : vector<40x1xf32> to vector<40x40xf32>
    %115 = arith.mulf %110, %114 : vector<40x40xf32>
    %116 = vector.broadcast %34 : vector<1x32xf32> to vector<40x32xf32>
    %117 = arith.mulf %47, %116 : vector<40x32xf32>
    %cst_34 = arith.constant dense<0.000000e+00> : vector<40x32xf32>
    %118 = tpu.matmul %115, %117, %cst_34 {dimension_numbers = #tpu.dot_dimension_numbers<[1], [0], [0], [1], [0, 0, 1, 1], [], []>} : vector<40x40xf32>, vector<40x32xf32>, vector<40x32xf32> -> vector<40x32xf32>
    %119 = arith.addf %101, %118 : vector<40x32xf32>
    %c0_35 = arith.constant 0 : index
    %c0_36 = arith.constant 0 : index
    %c0_37 = arith.constant 0 : index
    %120 = vector.load %arg10[%c0_35, %c0_36, %c0_37] : memref<2x32x32xf32, #tpu.memory_space<vmem>>, vector<1x32x32xf32>
    %121 = vector.shape_cast %120 : vector<1x32x32xf32> to vector<32x32xf32>
    %cst_38 = arith.constant dense<0.000000e+00> : vector<40x32xf32>
    %122 = tpu.matmul %119, %121, %cst_38 {dimension_numbers = #tpu.dot_dimension_numbers<[1], [0], [0], [1], [0, 0, 1, 1], [], []>} : vector<40x32xf32>, vector<32x32xf32>, vector<40x32xf32> -> vector<40x32xf32>
    %c0_39 = arith.constant 0 : index
    %c0_40 = arith.constant 0 : index
    %c0_41 = arith.constant 0 : index
    %123 = vector.load %arg11[%c0_39, %c0_40, %c0_41] : memref<2x1x32xf32, #tpu.memory_space<vmem>>, vector<1x1x32xf32>
    %124 = vector.shape_cast %123 : vector<1x1x32xf32> to vector<1x32xf32>
    %125 = vector.broadcast %124 : vector<1x32xf32> to vector<40x32xf32>
    %126 = arith.addf %122, %125 : vector<40x32xf32>
    %127 = arith.addf %5, %126 : vector<40x32xf32>
    %c0_42 = arith.constant 0 : index
    %c0_43 = arith.constant 0 : index
    %c0_44 = arith.constant 0 : index
    %128 = vector.load %arg12[%c0_42, %c0_43, %c0_44] : memref<2x1x32xf32, #tpu.memory_space<vmem>>, vector<1x1x32xf32>
    %129 = vector.shape_cast %128 : vector<1x1x32xf32> to vector<1x32xf32>
    %c0_45 = arith.constant 0 : index
    %c0_46 = arith.constant 0 : index
    %c0_47 = arith.constant 0 : index
    %130 = vector.load %arg13[%c0_45, %c0_46, %c0_47] : memref<2x1x32xf32, #tpu.memory_space<vmem>>, vector<1x1x32xf32>
    %131 = vector.shape_cast %130 : vector<1x1x32xf32> to vector<1x32xf32>
    %cst_48 = arith.constant dense<0.000000e+00> : vector<40xf32>
    %132 = vector.multi_reduction <add>, %127, %cst_48 [1] : vector<40x32xf32> to vector<40xf32>
    %133 = vector.shape_cast %132 : vector<40xf32> to vector<40x1xf32>
    %cst_49 = arith.constant 3.200000e+01 : f32
    %134 = vector.broadcast %cst_49 : f32 to vector<40x1xf32>
    %135 = arith.divf %133, %134 : vector<40x1xf32>
    %136 = vector.broadcast %135 : vector<40x1xf32> to vector<40x32xf32>
    %137 = arith.subf %127, %136 : vector<40x32xf32>
    %138 = arith.mulf %137, %137 : vector<40x32xf32>
    %cst_50 = arith.constant dense<0.000000e+00> : vector<40xf32>
    %139 = vector.multi_reduction <add>, %138, %cst_50 [1] : vector<40x32xf32> to vector<40xf32>
    %140 = vector.shape_cast %139 : vector<40xf32> to vector<40x1xf32>
    %cst_51 = arith.constant 3.200000e+01 : f32
    %141 = vector.broadcast %cst_51 : f32 to vector<40x1xf32>
    %142 = arith.divf %140, %141 : vector<40x1xf32>
    %cst_52 = arith.constant 9.99999974E-6 : f32
    %143 = vector.broadcast %cst_52 : f32 to vector<40x1xf32>
    %144 = arith.addf %142, %143 : vector<40x1xf32>
    %145 = math.rsqrt %144 : vector<40x1xf32>
    %146 = vector.broadcast %145 : vector<40x1xf32> to vector<40x32xf32>
    %147 = arith.mulf %137, %146 : vector<40x32xf32>
    %148 = vector.broadcast %129 : vector<1x32xf32> to vector<40x32xf32>
    %149 = arith.mulf %147, %148 : vector<40x32xf32>
    %150 = vector.broadcast %131 : vector<1x32xf32> to vector<40x32xf32>
    %151 = arith.addf %149, %150 : vector<40x32xf32>
    %c0_53 = arith.constant 0 : index
    %c0_54 = arith.constant 0 : index
    %c0_55 = arith.constant 0 : index
    %152 = vector.load %arg14[%c0_53, %c0_54, %c0_55] : memref<2x32x128xf32, #tpu.memory_space<vmem>>, vector<1x32x128xf32>
    %153 = vector.shape_cast %152 : vector<1x32x128xf32> to vector<32x128xf32>
    %cst_56 = arith.constant dense<0.000000e+00> : vector<40x128xf32>
    %154 = tpu.matmul %151, %153, %cst_56 {dimension_numbers = #tpu.dot_dimension_numbers<[1], [0], [0], [1], [0, 0, 1, 1], [], []>} : vector<40x32xf32>, vector<32x128xf32>, vector<40x128xf32> -> vector<40x128xf32>
    %c0_57 = arith.constant 0 : index
    %c0_58 = arith.constant 0 : index
    %c0_59 = arith.constant 0 : index
    %155 = vector.load %arg15[%c0_57, %c0_58, %c0_59] : memref<2x1x128xf32, #tpu.memory_space<vmem>>, vector<1x1x128xf32>
    %156 = vector.shape_cast %155 : vector<1x1x128xf32> to vector<1x128xf32>
    %157 = vector.broadcast %156 : vector<1x128xf32> to vector<40x128xf32>
    %158 = arith.addf %154, %157 : vector<40x128xf32>
    %159 = vector.extract_strided_slice %158 {offsets = [0, 0], sizes = [40, 64], strides = [1, 1]} : vector<40x128xf32> to vector<40x64xf32>
    %160 = vector.extract_strided_slice %158 {offsets = [0, 64], sizes = [40, 64], strides = [1, 1]} : vector<40x128xf32> to vector<40x64xf32>
    %cst_60 = arith.constant 0.000000e+00 : f32
    %161 = vector.broadcast %cst_60 : f32 to vector<40x64xf32>
    %162 = arith.maximumf %160, %161 : vector<40x64xf32>
    %163 = arith.mulf %159, %162 : vector<40x64xf32>
    %c0_61 = arith.constant 0 : index
    %c0_62 = arith.constant 0 : index
    %c0_63 = arith.constant 0 : index
    %164 = vector.load %arg16[%c0_61, %c0_62, %c0_63] : memref<2x64x32xf32, #tpu.memory_space<vmem>>, vector<1x64x32xf32>
    %165 = vector.shape_cast %164 : vector<1x64x32xf32> to vector<64x32xf32>
    %cst_64 = arith.constant dense<0.000000e+00> : vector<40x32xf32>
    %166 = tpu.matmul %163, %165, %cst_64 {dimension_numbers = #tpu.dot_dimension_numbers<[1], [0], [0], [1], [0, 0, 1, 1], [], []>} : vector<40x64xf32>, vector<64x32xf32>, vector<40x32xf32> -> vector<40x32xf32>
    %c0_65 = arith.constant 0 : index
    %c0_66 = arith.constant 0 : index
    %c0_67 = arith.constant 0 : index
    %167 = vector.load %arg17[%c0_65, %c0_66, %c0_67] : memref<2x1x32xf32, #tpu.memory_space<vmem>>, vector<1x1x32xf32>
    %168 = vector.shape_cast %167 : vector<1x1x32xf32> to vector<1x32xf32>
    %169 = vector.broadcast %168 : vector<1x32xf32> to vector<40x32xf32>
    %170 = arith.addf %166, %169 : vector<40x32xf32>
    %171 = arith.addf %127, %170 : vector<40x32xf32>
    %c1 = arith.constant 1 : index
    %c0_68 = arith.constant 0 : index
    %c0_69 = arith.constant 0 : index
    %172 = vector.load %arg6[%c1, %c0_68, %c0_69] : memref<2x1x32xf32, #tpu.memory_space<vmem>>, vector<1x1x32xf32>
    %173 = vector.shape_cast %172 : vector<1x1x32xf32> to vector<1x32xf32>
    %c1_70 = arith.constant 1 : index
    %c0_71 = arith.constant 0 : index
    %c0_72 = arith.constant 0 : index
    %174 = vector.load %arg7[%c1_70, %c0_71, %c0_72] : memref<2x1x32xf32, #tpu.memory_space<vmem>>, vector<1x1x32xf32>
    %175 = vector.shape_cast %174 : vector<1x1x32xf32> to vector<1x32xf32>
    %cst_73 = arith.constant dense<0.000000e+00> : vector<40xf32>
    %176 = vector.multi_reduction <add>, %171, %cst_73 [1] : vector<40x32xf32> to vector<40xf32>
    %177 = vector.shape_cast %176 : vector<40xf32> to vector<40x1xf32>
    %cst_74 = arith.constant 3.200000e+01 : f32
    %178 = vector.broadcast %cst_74 : f32 to vector<40x1xf32>
    %179 = arith.divf %177, %178 : vector<40x1xf32>
    %180 = vector.broadcast %179 : vector<40x1xf32> to vector<40x32xf32>
    %181 = arith.subf %171, %180 : vector<40x32xf32>
    %182 = arith.mulf %181, %181 : vector<40x32xf32>
    %cst_75 = arith.constant dense<0.000000e+00> : vector<40xf32>
    %183 = vector.multi_reduction <add>, %182, %cst_75 [1] : vector<40x32xf32> to vector<40xf32>
    %184 = vector.shape_cast %183 : vector<40xf32> to vector<40x1xf32>
    %cst_76 = arith.constant 3.200000e+01 : f32
    %185 = vector.broadcast %cst_76 : f32 to vector<40x1xf32>
    %186 = arith.divf %184, %185 : vector<40x1xf32>
    %cst_77 = arith.constant 9.99999974E-6 : f32
    %187 = vector.broadcast %cst_77 : f32 to vector<40x1xf32>
    %188 = arith.addf %186, %187 : vector<40x1xf32>
    %189 = math.rsqrt %188 : vector<40x1xf32>
    %190 = vector.broadcast %189 : vector<40x1xf32> to vector<40x32xf32>
    %191 = arith.mulf %181, %190 : vector<40x32xf32>
    %192 = vector.broadcast %173 : vector<1x32xf32> to vector<40x32xf32>
    %193 = arith.mulf %191, %192 : vector<40x32xf32>
    %194 = vector.broadcast %175 : vector<1x32xf32> to vector<40x32xf32>
    %195 = arith.addf %193, %194 : vector<40x32xf32>
    %c1_78 = arith.constant 1 : index
    %c0_79 = arith.constant 0 : index
    %c0_80 = arith.constant 0 : index
    %196 = vector.load %arg8[%c1_78, %c0_79, %c0_80] : memref<2x32x96xf32, #tpu.memory_space<vmem>>, vector<1x32x96xf32>
    %197 = vector.shape_cast %196 : vector<1x32x96xf32> to vector<32x96xf32>
    %cst_81 = arith.constant dense<0.000000e+00> : vector<40x96xf32>
    %198 = tpu.matmul %195, %197, %cst_81 {dimension_numbers = #tpu.dot_dimension_numbers<[1], [0], [0], [1], [0, 0, 1, 1], [], []>} : vector<40x32xf32>, vector<32x96xf32>, vector<40x96xf32> -> vector<40x96xf32>
    %c1_82 = arith.constant 1 : index
    %c0_83 = arith.constant 0 : index
    %c0_84 = arith.constant 0 : index
    %199 = vector.load %arg9[%c1_82, %c0_83, %c0_84] : memref<2x1x96xf32, #tpu.memory_space<vmem>>, vector<1x1x96xf32>
    %200 = vector.shape_cast %199 : vector<1x1x96xf32> to vector<1x96xf32>
    %201 = vector.broadcast %200 : vector<1x96xf32> to vector<40x96xf32>
    %202 = arith.addf %198, %201 : vector<40x96xf32>
    %203 = vector.extract_strided_slice %202 {offsets = [0, 0], sizes = [40, 32], strides = [1, 1]} : vector<40x96xf32> to vector<40x32xf32>
    %cst_85 = arith.constant 0.353553385 : f32
    %204 = vector.broadcast %cst_85 : f32 to vector<40x32xf32>
    %205 = arith.mulf %203, %204 : vector<40x32xf32>
    %206 = vector.extract_strided_slice %202 {offsets = [0, 32], sizes = [40, 32], strides = [1, 1]} : vector<40x96xf32> to vector<40x32xf32>
    %207 = vector.extract_strided_slice %202 {offsets = [0, 64], sizes = [40, 32], strides = [1, 1]} : vector<40x96xf32> to vector<40x32xf32>
    %cst_86 = arith.constant dense<0.000000e+00> : vector<8x32xf32>
    %208 = tpu.matmul %35, %205, %cst_86 {dimension_numbers = #tpu.dot_dimension_numbers<[1], [0], [0], [1], [0, 0, 1, 1], [], []>} : vector<8x40xf32>, vector<40x32xf32>, vector<8x32xf32> -> vector<8x32xf32>
    %cst_87 = arith.constant dense<0.000000e+00> : vector<8x32xf32>
    %209 = tpu.matmul %35, %171, %cst_87 {dimension_numbers = #tpu.dot_dimension_numbers<[1], [0], [0], [1], [0, 0, 1, 1], [], []>} : vector<8x40xf32>, vector<40x32xf32>, vector<8x32xf32> -> vector<8x32xf32>
    %c0_88 = arith.constant 0 : index
    %c0_89 = arith.constant 0 : index
    %210 = vector.load %arg4[%c0_88, %c0_89] : memref<8x40xf32, #tpu.memory_space<vmem>>, vector<8x40xf32>
    %211 = vector.broadcast %13 : vector<1x32xf32> to vector<8x32xf32>
    %212 = arith.mulf %208, %211 : vector<8x32xf32>
    %cst_90 = arith.constant dense<0.000000e+00> : vector<8x40xf32>
    %213 = tpu.matmul %212, %206, %cst_90 {dimension_numbers = #tpu.dot_dimension_numbers<[1], [1], [0], [0], [0, 0, 1, 0], [], []>} : vector<8x32xf32>, vector<40x32xf32>, vector<8x40xf32> -> vector<8x40xf32>
    %214 = arith.addf %213, %210 : vector<8x40xf32>
    %cst_91 = arith.constant dense<0xFF800000> : vector<8xf32>
    %215 = vector.multi_reduction <maximumf>, %214, %cst_91 [1] : vector<8x40xf32> to vector<8xf32>
    %216 = vector.shape_cast %215 : vector<8xf32> to vector<8x1xf32>
    %217 = vector.broadcast %216 : vector<8x1xf32> to vector<8x40xf32>
    %218 = arith.subf %214, %217 : vector<8x40xf32>
    %219 = math.exp %218 : vector<8x40xf32>
    %cst_92 = arith.constant dense<0.000000e+00> : vector<8xf32>
    %220 = vector.multi_reduction <add>, %219, %cst_92 [1] : vector<8x40xf32> to vector<8xf32>
    %221 = vector.shape_cast %220 : vector<8xf32> to vector<8x1xf32>
    %222 = tpu.reciprocal %221 {approx = true} : vector<8x1xf32> -> vector<8x1xf32>
    %223 = vector.broadcast %222 : vector<8x1xf32> to vector<8x40xf32>
    %224 = arith.mulf %219, %223 : vector<8x40xf32>
    %225 = vector.broadcast %13 : vector<1x32xf32> to vector<40x32xf32>
    %226 = arith.mulf %207, %225 : vector<40x32xf32>
    %cst_93 = arith.constant dense<0.000000e+00> : vector<8x32xf32>
    %227 = tpu.matmul %224, %226, %cst_93 {dimension_numbers = #tpu.dot_dimension_numbers<[1], [0], [0], [1], [0, 0, 1, 1], [], []>} : vector<8x40xf32>, vector<40x32xf32>, vector<8x32xf32> -> vector<8x32xf32>
    %228 = vector.broadcast %20 : vector<1x32xf32> to vector<8x32xf32>
    %229 = arith.mulf %208, %228 : vector<8x32xf32>
    %cst_94 = arith.constant dense<0.000000e+00> : vector<8x40xf32>
    %230 = tpu.matmul %229, %206, %cst_94 {dimension_numbers = #tpu.dot_dimension_numbers<[1], [1], [0], [0], [0, 0, 1, 0], [], []>} : vector<8x32xf32>, vector<40x32xf32>, vector<8x40xf32> -> vector<8x40xf32>
    %231 = arith.addf %230, %210 : vector<8x40xf32>
    %cst_95 = arith.constant dense<0xFF800000> : vector<8xf32>
    %232 = vector.multi_reduction <maximumf>, %231, %cst_95 [1] : vector<8x40xf32> to vector<8xf32>
    %233 = vector.shape_cast %232 : vector<8xf32> to vector<8x1xf32>
    %234 = vector.broadcast %233 : vector<8x1xf32> to vector<8x40xf32>
    %235 = arith.subf %231, %234 : vector<8x40xf32>
    %236 = math.exp %235 : vector<8x40xf32>
    %cst_96 = arith.constant dense<0.000000e+00> : vector<8xf32>
    %237 = vector.multi_reduction <add>, %236, %cst_96 [1] : vector<8x40xf32> to vector<8xf32>
    %238 = vector.shape_cast %237 : vector<8xf32> to vector<8x1xf32>
    %239 = tpu.reciprocal %238 {approx = true} : vector<8x1xf32> -> vector<8x1xf32>
    %240 = vector.broadcast %239 : vector<8x1xf32> to vector<8x40xf32>
    %241 = arith.mulf %236, %240 : vector<8x40xf32>
    %242 = vector.broadcast %20 : vector<1x32xf32> to vector<40x32xf32>
    %243 = arith.mulf %207, %242 : vector<40x32xf32>
    %cst_97 = arith.constant dense<0.000000e+00> : vector<8x32xf32>
    %244 = tpu.matmul %241, %243, %cst_97 {dimension_numbers = #tpu.dot_dimension_numbers<[1], [0], [0], [1], [0, 0, 1, 1], [], []>} : vector<8x40xf32>, vector<40x32xf32>, vector<8x32xf32> -> vector<8x32xf32>
    %245 = arith.addf %227, %244 : vector<8x32xf32>
    %246 = vector.broadcast %27 : vector<1x32xf32> to vector<8x32xf32>
    %247 = arith.mulf %208, %246 : vector<8x32xf32>
    %cst_98 = arith.constant dense<0.000000e+00> : vector<8x40xf32>
    %248 = tpu.matmul %247, %206, %cst_98 {dimension_numbers = #tpu.dot_dimension_numbers<[1], [1], [0], [0], [0, 0, 1, 0], [], []>} : vector<8x32xf32>, vector<40x32xf32>, vector<8x40xf32> -> vector<8x40xf32>
    %249 = arith.addf %248, %210 : vector<8x40xf32>
    %cst_99 = arith.constant dense<0xFF800000> : vector<8xf32>
    %250 = vector.multi_reduction <maximumf>, %249, %cst_99 [1] : vector<8x40xf32> to vector<8xf32>
    %251 = vector.shape_cast %250 : vector<8xf32> to vector<8x1xf32>
    %252 = vector.broadcast %251 : vector<8x1xf32> to vector<8x40xf32>
    %253 = arith.subf %249, %252 : vector<8x40xf32>
    %254 = math.exp %253 : vector<8x40xf32>
    %cst_100 = arith.constant dense<0.000000e+00> : vector<8xf32>
    %255 = vector.multi_reduction <add>, %254, %cst_100 [1] : vector<8x40xf32> to vector<8xf32>
    %256 = vector.shape_cast %255 : vector<8xf32> to vector<8x1xf32>
    %257 = tpu.reciprocal %256 {approx = true} : vector<8x1xf32> -> vector<8x1xf32>
    %258 = vector.broadcast %257 : vector<8x1xf32> to vector<8x40xf32>
    %259 = arith.mulf %254, %258 : vector<8x40xf32>
    %260 = vector.broadcast %27 : vector<1x32xf32> to vector<40x32xf32>
    %261 = arith.mulf %207, %260 : vector<40x32xf32>
    %cst_101 = arith.constant dense<0.000000e+00> : vector<8x32xf32>
    %262 = tpu.matmul %259, %261, %cst_101 {dimension_numbers = #tpu.dot_dimension_numbers<[1], [0], [0], [1], [0, 0, 1, 1], [], []>} : vector<8x40xf32>, vector<40x32xf32>, vector<8x32xf32> -> vector<8x32xf32>
    %263 = arith.addf %245, %262 : vector<8x32xf32>
    %264 = vector.broadcast %34 : vector<1x32xf32> to vector<8x32xf32>
    %265 = arith.mulf %208, %264 : vector<8x32xf32>
    %cst_102 = arith.constant dense<0.000000e+00> : vector<8x40xf32>
    %266 = tpu.matmul %265, %206, %cst_102 {dimension_numbers = #tpu.dot_dimension_numbers<[1], [1], [0], [0], [0, 0, 1, 0], [], []>} : vector<8x32xf32>, vector<40x32xf32>, vector<8x40xf32> -> vector<8x40xf32>
    %267 = arith.addf %266, %210 : vector<8x40xf32>
    %cst_103 = arith.constant dense<0xFF800000> : vector<8xf32>
    %268 = vector.multi_reduction <maximumf>, %267, %cst_103 [1] : vector<8x40xf32> to vector<8xf32>
    %269 = vector.shape_cast %268 : vector<8xf32> to vector<8x1xf32>
    %270 = vector.broadcast %269 : vector<8x1xf32> to vector<8x40xf32>
    %271 = arith.subf %267, %270 : vector<8x40xf32>
    %272 = math.exp %271 : vector<8x40xf32>
    %cst_104 = arith.constant dense<0.000000e+00> : vector<8xf32>
    %273 = vector.multi_reduction <add>, %272, %cst_104 [1] : vector<8x40xf32> to vector<8xf32>
    %274 = vector.shape_cast %273 : vector<8xf32> to vector<8x1xf32>
    %275 = tpu.reciprocal %274 {approx = true} : vector<8x1xf32> -> vector<8x1xf32>
    %276 = vector.broadcast %275 : vector<8x1xf32> to vector<8x40xf32>
    %277 = arith.mulf %272, %276 : vector<8x40xf32>
    %278 = vector.broadcast %34 : vector<1x32xf32> to vector<40x32xf32>
    %279 = arith.mulf %207, %278 : vector<40x32xf32>
    %cst_105 = arith.constant dense<0.000000e+00> : vector<8x32xf32>
    %280 = tpu.matmul %277, %279, %cst_105 {dimension_numbers = #tpu.dot_dimension_numbers<[1], [0], [0], [1], [0, 0, 1, 1], [], []>} : vector<8x40xf32>, vector<40x32xf32>, vector<8x32xf32> -> vector<8x32xf32>
    %281 = arith.addf %263, %280 : vector<8x32xf32>
    %c1_106 = arith.constant 1 : index
    %c0_107 = arith.constant 0 : index
    %c0_108 = arith.constant 0 : index
    %282 = vector.load %arg10[%c1_106, %c0_107, %c0_108] : memref<2x32x32xf32, #tpu.memory_space<vmem>>, vector<1x32x32xf32>
    %283 = vector.shape_cast %282 : vector<1x32x32xf32> to vector<32x32xf32>
    %cst_109 = arith.constant dense<0.000000e+00> : vector<8x32xf32>
    %284 = tpu.matmul %281, %283, %cst_109 {dimension_numbers = #tpu.dot_dimension_numbers<[1], [0], [0], [1], [0, 0, 1, 1], [], []>} : vector<8x32xf32>, vector<32x32xf32>, vector<8x32xf32> -> vector<8x32xf32>
    %c1_110 = arith.constant 1 : index
    %c0_111 = arith.constant 0 : index
    %c0_112 = arith.constant 0 : index
    %285 = vector.load %arg11[%c1_110, %c0_111, %c0_112] : memref<2x1x32xf32, #tpu.memory_space<vmem>>, vector<1x1x32xf32>
    %286 = vector.shape_cast %285 : vector<1x1x32xf32> to vector<1x32xf32>
    %287 = vector.broadcast %286 : vector<1x32xf32> to vector<8x32xf32>
    %288 = arith.addf %284, %287 : vector<8x32xf32>
    %289 = arith.addf %209, %288 : vector<8x32xf32>
    %c1_113 = arith.constant 1 : index
    %c0_114 = arith.constant 0 : index
    %c0_115 = arith.constant 0 : index
    %290 = vector.load %arg12[%c1_113, %c0_114, %c0_115] : memref<2x1x32xf32, #tpu.memory_space<vmem>>, vector<1x1x32xf32>
    %291 = vector.shape_cast %290 : vector<1x1x32xf32> to vector<1x32xf32>
    %c1_116 = arith.constant 1 : index
    %c0_117 = arith.constant 0 : index
    %c0_118 = arith.constant 0 : index
    %292 = vector.load %arg13[%c1_116, %c0_117, %c0_118] : memref<2x1x32xf32, #tpu.memory_space<vmem>>, vector<1x1x32xf32>
    %293 = vector.shape_cast %292 : vector<1x1x32xf32> to vector<1x32xf32>
    %cst_119 = arith.constant dense<0.000000e+00> : vector<8xf32>
    %294 = vector.multi_reduction <add>, %289, %cst_119 [1] : vector<8x32xf32> to vector<8xf32>
    %295 = vector.shape_cast %294 : vector<8xf32> to vector<8x1xf32>
    %cst_120 = arith.constant 3.200000e+01 : f32
    %296 = vector.broadcast %cst_120 : f32 to vector<8x1xf32>
    %297 = arith.divf %295, %296 : vector<8x1xf32>
    %298 = vector.broadcast %297 : vector<8x1xf32> to vector<8x32xf32>
    %299 = arith.subf %289, %298 : vector<8x32xf32>
    %300 = arith.mulf %299, %299 : vector<8x32xf32>
    %cst_121 = arith.constant dense<0.000000e+00> : vector<8xf32>
    %301 = vector.multi_reduction <add>, %300, %cst_121 [1] : vector<8x32xf32> to vector<8xf32>
    %302 = vector.shape_cast %301 : vector<8xf32> to vector<8x1xf32>
    %cst_122 = arith.constant 3.200000e+01 : f32
    %303 = vector.broadcast %cst_122 : f32 to vector<8x1xf32>
    %304 = arith.divf %302, %303 : vector<8x1xf32>
    %cst_123 = arith.constant 9.99999974E-6 : f32
    %305 = vector.broadcast %cst_123 : f32 to vector<8x1xf32>
    %306 = arith.addf %304, %305 : vector<8x1xf32>
    %307 = math.rsqrt %306 : vector<8x1xf32>
    %308 = vector.broadcast %307 : vector<8x1xf32> to vector<8x32xf32>
    %309 = arith.mulf %299, %308 : vector<8x32xf32>
    %310 = vector.broadcast %291 : vector<1x32xf32> to vector<8x32xf32>
    %311 = arith.mulf %309, %310 : vector<8x32xf32>
    %312 = vector.broadcast %293 : vector<1x32xf32> to vector<8x32xf32>
    %313 = arith.addf %311, %312 : vector<8x32xf32>
    %c1_124 = arith.constant 1 : index
    %c0_125 = arith.constant 0 : index
    %c0_126 = arith.constant 0 : index
    %314 = vector.load %arg14[%c1_124, %c0_125, %c0_126] : memref<2x32x128xf32, #tpu.memory_space<vmem>>, vector<1x32x128xf32>
    %315 = vector.shape_cast %314 : vector<1x32x128xf32> to vector<32x128xf32>
    %cst_127 = arith.constant dense<0.000000e+00> : vector<8x128xf32>
    %316 = tpu.matmul %313, %315, %cst_127 {dimension_numbers = #tpu.dot_dimension_numbers<[1], [0], [0], [1], [0, 0, 1, 1], [], []>} : vector<8x32xf32>, vector<32x128xf32>, vector<8x128xf32> -> vector<8x128xf32>
    %c1_128 = arith.constant 1 : index
    %c0_129 = arith.constant 0 : index
    %c0_130 = arith.constant 0 : index
    %317 = vector.load %arg15[%c1_128, %c0_129, %c0_130] : memref<2x1x128xf32, #tpu.memory_space<vmem>>, vector<1x1x128xf32>
    %318 = vector.shape_cast %317 : vector<1x1x128xf32> to vector<1x128xf32>
    %319 = vector.broadcast %318 : vector<1x128xf32> to vector<8x128xf32>
    %320 = arith.addf %316, %319 : vector<8x128xf32>
    %321 = vector.extract_strided_slice %320 {offsets = [0, 0], sizes = [8, 64], strides = [1, 1]} : vector<8x128xf32> to vector<8x64xf32>
    %322 = vector.extract_strided_slice %320 {offsets = [0, 64], sizes = [8, 64], strides = [1, 1]} : vector<8x128xf32> to vector<8x64xf32>
    %cst_131 = arith.constant 0.000000e+00 : f32
    %323 = vector.broadcast %cst_131 : f32 to vector<8x64xf32>
    %324 = arith.maximumf %322, %323 : vector<8x64xf32>
    %325 = arith.mulf %321, %324 : vector<8x64xf32>
    %c1_132 = arith.constant 1 : index
    %c0_133 = arith.constant 0 : index
    %c0_134 = arith.constant 0 : index
    %326 = vector.load %arg16[%c1_132, %c0_133, %c0_134] : memref<2x64x32xf32, #tpu.memory_space<vmem>>, vector<1x64x32xf32>
    %327 = vector.shape_cast %326 : vector<1x64x32xf32> to vector<64x32xf32>
    %cst_135 = arith.constant dense<0.000000e+00> : vector<8x32xf32>
    %328 = tpu.matmul %325, %327, %cst_135 {dimension_numbers = #tpu.dot_dimension_numbers<[1], [0], [0], [1], [0, 0, 1, 1], [], []>} : vector<8x64xf32>, vector<64x32xf32>, vector<8x32xf32> -> vector<8x32xf32>
    %c1_136 = arith.constant 1 : index
    %c0_137 = arith.constant 0 : index
    %c0_138 = arith.constant 0 : index
    %329 = vector.load %arg17[%c1_136, %c0_137, %c0_138] : memref<2x1x32xf32, #tpu.memory_space<vmem>>, vector<1x1x32xf32>
    %330 = vector.shape_cast %329 : vector<1x1x32xf32> to vector<1x32xf32>
    %331 = vector.broadcast %330 : vector<1x32xf32> to vector<8x32xf32>
    %332 = arith.addf %328, %331 : vector<8x32xf32>
    %333 = arith.addf %289, %332 : vector<8x32xf32>
    %c0_139 = arith.constant 0 : index
    %c0_140 = arith.constant 0 : index
    %334 = vector.load %arg18[%c0_139, %c0_140] : memref<1x32xf32, #tpu.memory_space<vmem>>, vector<1x32xf32>
    %c0_141 = arith.constant 0 : index
    %c0_142 = arith.constant 0 : index
    %335 = vector.load %arg19[%c0_141, %c0_142] : memref<1x32xf32, #tpu.memory_space<vmem>>, vector<1x32xf32>
    %cst_143 = arith.constant dense<0.000000e+00> : vector<8xf32>
    %336 = vector.multi_reduction <add>, %333, %cst_143 [1] : vector<8x32xf32> to vector<8xf32>
    %337 = vector.shape_cast %336 : vector<8xf32> to vector<8x1xf32>
    %cst_144 = arith.constant 3.200000e+01 : f32
    %338 = vector.broadcast %cst_144 : f32 to vector<8x1xf32>
    %339 = arith.divf %337, %338 : vector<8x1xf32>
    %340 = vector.broadcast %339 : vector<8x1xf32> to vector<8x32xf32>
    %341 = arith.subf %333, %340 : vector<8x32xf32>
    %342 = arith.mulf %341, %341 : vector<8x32xf32>
    %cst_145 = arith.constant dense<0.000000e+00> : vector<8xf32>
    %343 = vector.multi_reduction <add>, %342, %cst_145 [1] : vector<8x32xf32> to vector<8xf32>
    %344 = vector.shape_cast %343 : vector<8xf32> to vector<8x1xf32>
    %cst_146 = arith.constant 3.200000e+01 : f32
    %345 = vector.broadcast %cst_146 : f32 to vector<8x1xf32>
    %346 = arith.divf %344, %345 : vector<8x1xf32>
    %cst_147 = arith.constant 9.99999974E-6 : f32
    %347 = vector.broadcast %cst_147 : f32 to vector<8x1xf32>
    %348 = arith.addf %346, %347 : vector<8x1xf32>
    %349 = math.rsqrt %348 : vector<8x1xf32>
    %350 = vector.broadcast %349 : vector<8x1xf32> to vector<8x32xf32>
    %351 = arith.mulf %341, %350 : vector<8x32xf32>
    %352 = vector.broadcast %334 : vector<1x32xf32> to vector<8x32xf32>
    %353 = arith.mulf %351, %352 : vector<8x32xf32>
    %354 = vector.broadcast %335 : vector<1x32xf32> to vector<8x32xf32>
    %355 = arith.addf %353, %354 : vector<8x32xf32>
    %cst_148 = arith.constant 0.000000e+00 : f32
    %356 = vector.broadcast %cst_148 : f32 to vector<8x32xf32>
    %357 = arith.maximumf %355, %356 : vector<8x32xf32>
    %c0_149 = arith.constant 0 : index
    %c0_150 = arith.constant 0 : index
    %358 = vector.load %arg20[%c0_149, %c0_150] : memref<32x1xf32, #tpu.memory_space<vmem>>, vector<32x1xf32>
    %cst_151 = arith.constant dense<0.000000e+00> : vector<8x1xf32>
    %359 = tpu.matmul %357, %358, %cst_151 {dimension_numbers = #tpu.dot_dimension_numbers<[1], [0], [0], [1], [0, 0, 1, 1], [], []>} : vector<8x32xf32>, vector<32x1xf32>, vector<8x1xf32> -> vector<8x1xf32>
    %c0_152 = arith.constant 0 : index
    %c0_153 = arith.constant 0 : index
    %360 = vector.load %arg21[%c0_152, %c0_153] : memref<1x1xf32, #tpu.memory_space<vmem>>, vector<1x1xf32>
    %361 = vector.broadcast %360 : vector<1x1xf32> to vector<8x1xf32>
    %362 = arith.addf %359, %361 : vector<8x1xf32>
    %c0_154 = arith.constant 0 : index
    %c0_155 = arith.constant 0 : index
    %363 = vector.load %arg22[%c0_154, %c0_155] : memref<8x1xf32, #tpu.memory_space<vmem>>, vector<8x1xf32>
    tpu.vector_store %arg22[%c0_154, %c0_155], %362 {strides = array<i32>} : memref<8x1xf32, #tpu.memory_space<vmem>>, vector<8x1xf32>,
    return
  }
}

</mosaic_0001>

<bundles_post_ra>
// kernel: transformer_forward.1
= control target key start
LH: loop header
LB: loop body
LE: loop exit
PB: predicated region body
PF: predicated region fallthrough
CT: control target
= control target key end

     0   :  { %v2537_v0 = vmov 0   ;;  %vm154_vm0 = vcmask 261120   ;;  %v123_v35 = vlaneseq  ;;  %v2538_v37 = vmov 0.0   ;;  %s2539_s30 = smov 96   ;;  %s3775_s0 = inlined_call_operand.vmem [shape: f32[40,1], index: 0, kind: input, shape index: {}]   ;;  %s3776_s8 = inlined_call_operand.vmem [shape: f32[2,32,96], index: 8, kind: input, shape index: {}]   ;;  %s3777_s9 = inlined_call_operand.vmem [shape: f32[2,1,96], index: 9, kind: input, shape index: {}]   ;;  %s3778_s1 = inlined_call_operand.vmem [shape: f32[40,32], index: 1, kind: input, shape index: {}]   ;;  %s3779_s2 = inlined_call_operand.vmem [shape: f32[40,32], index: 2, kind: input, shape index: {}]   ;;  %s3780_s3 = inlined_call_operand.vmem [shape: f32[40,40], index: 3, kind: input, shape index: {}]   ;;  %s3781_s10 = inlined_call_operand.vmem [shape: f32[2,32,32], index: 10, kind: input, shape index: {}]   ;;  %s3782_s11 = inlined_call_operand.vmem [shape: f32[2,1,32], index: 11, kind: input, shape index: {}]   ;;  %s3783_s12 = inlined_call_operand.vmem [shape: f32[2,1,32], index: 12, kind: input, shape index: {}]   ;;  %s3784_s13 = inlined_call_operand.vmem [shape: f32[2,1,32], index: 13, kind: input, shape index: {}]   ;;  %s3785_s15 = inlined_call_operand.vmem [shape: f32[2,1,128], index: 15, kind: input, shape index: {}]   ;;  %s3786_s14 = inlined_call_operand.vmem [shape: f32[2,32,128], index: 14, kind: input, shape index: {}]   ;;  %s3787_s17 = inlined_call_operand.vmem [shape: f32[2,1,32], index: 17, kind: input, shape index: {}]   ;;  %s3788_s16 = inlined_call_operand.vmem [shape: f32[2,64,32], index: 16, kind: input, shape index: {}]   ;;  %s3789_s6 = inlined_call_operand.vmem [shape: f32[2,1,32], index: 6, kind: input, shape index: {}]   ;;  %s3790_s7 = inlined_call_operand.vmem [shape: f32[2,1,32], index: 7, kind: input, shape index: {}]   ;;  %s3791_s5 = inlined_call_operand.vmem [shape: f32[8,40], index: 5, kind: input, shape index: {}]   ;;  %s3792_s4 = inlined_call_operand.vmem [shape: f32[8,40], index: 4, kind: input, shape index: {}]   ;;  %s3793_s18 = inlined_call_operand.vmem [shape: f32[1,32], index: 18, kind: input, shape index: {}]   ;;  %s3794_s19 = inlined_call_operand.vmem [shape: f32[1,32], index: 19, kind: input, shape index: {}]   ;;  %s3795_s20 = inlined_call_operand.vmem [shape: f32[32,1], index: 20, kind: input, shape index: {}]   ;;  %s3796_s21 = inlined_call_operand.<no memory space> [shape: f32[1,1], index: 21, kind: input, shape index: {}]   ;;  %s3797_s22 = inlined_call_operand.vmem [shape: f32[8,1], index: 22, kind: output, shape index: {}]  }
   0x1   :  { %3805 = sst [smem:[#allocation3_spill]] %s3775_s0  ;;  %2290 = vset.pattern.permute.xlu0 %v2537_v0  ;;  %2291 = vset.pattern.permute.xlu1 %v2537_v0  ;;  %vm289_vm11 = vcmask 326656  }
   0x2   :  { %3806 = sst [smem:[#allocation4_spill]] %s3776_s8  ;;  %2292 = vset.pattern.permute.xlu2 %v2537_v0  ;;  %v124_v36 = vand.u32 127, %v123_v35 }
   0x3   :  { %3807 = sst [smem:[#allocation5_spill]] %s3777_s9 }
   0x4   :  { %3808 = sst [smem:[#allocation6_spill]] %s3778_s1  ;;  %vm140_vm1 = vcmp.ge.s32.totalorder %v124_v36, 24  ;;  %vm141_vm2 = vcmp.lt.s32.totalorder %v124_v36, 32  ;;  %vm126_vm3 = vcmp.lt.s32.totalorder %v124_v36, 8  ;;  %vm135_vm4 = vcmp.ge.s32.totalorder %v124_v36, 16 }
   0x5   :  { %3809 = sst [smem:[#allocation7_spill]] %s3779_s2  ;;  %vm136_vm5 = vcmp.lt.s32.totalorder %v124_v36, 24  ;;  %v2734_v38 = vsel %vm126_vm3, 1.0, %v2538_v37  ;;  %vm142_vm6 = vmand %vm140_vm1, %vm141_vm2  ;;  %vm130_vm8 = vcmp.ge.s32.totalorder %v124_v36, 8  ;;  %vm131_vm9 = vcmp.lt.s32.totalorder %v124_v36, 16  ;;  %s2540_s2 = smov 64  }
   0x6   :  { %3810 = sst [smem:[#allocation8_spill]] %s3780_s3  ;;  %v2736_v39 = vsel %vm142_vm6, 1.0, %v2538_v37  ;;  %vm137_vm7 = vmand %vm135_vm4, %vm136_vm5 }
   0x7   :  { %3811 = sst [smem:[#allocation9_spill]] %s3781_s10  ;;  %v2738_v40 = vsel %vm137_vm7, 1.0, %v2538_v37  ;;  %vm132_vm10 = vmand %vm130_vm8, %vm131_vm9 }
   0x8   :  { %s3812_s29 = sld [smem:[#allocation3_spill]]  ;;  %v2761_v52 = vsel %vm132_vm10, 1.0, %v2538_v37 }
   0x9   :  { %s3813_s24 = sld [smem:[#allocation4_spill]] }
   0xa   :  { %s3814_s8 = sld [smem:[#allocation6_spill]] }
   0xb   :  { %s3815_s26 = sld [smem:[#allocation7_spill]] }
   0xc   :  { %s3816_s28 = sld [smem:[#allocation5_spill]] }
   0xd   :  { %s3817_s23 = sld [smem:[#allocation8_spill]] }
   0xe   :  { %v73_v1 = vld [vmem:[%s3812_s29] sm:$0xff]  ;;  %v75_v2 = vld [vmem:[%s3812_s29 + $0x10] sm:$0xff]  ;;  %v74_v6 = vld [vmem:[%s3812_s29 + $0x8] sm:$0xff] }
   0xf   :  { %85 = vperm.xlu0 %2290, %v73_v1   ;;  %95 = vperm.xlu1 %2291, %v75_v2   ;;  %v77_v3 = vld [vmem:[%s3812_s29 + $0x20] sm:$0xff]  ;;  %v149_v4 = vld [vmem:[%s3813_s24 + $0x18] sm:$0xff]  ;;  %v148_v5 = vld [vmem:[%s3813_s24 + $0x10] sm:$0xff] }
  0x10   :  { %182 = vmatpush.msra.mxu0 %v149_v4  ;;  %105 = vperm.xlu2 %2292, %v77_v3   ;;  %v76_v7 = vld [vmem:[%s3812_s29 + $0x18] sm:$0xff]  ;;  %v147_v8 = vld [vmem:[%s3813_s24 + $0x8] sm:$0xff]  ;;  %v146_v9 = vld [vmem:[%s3813_s24] sm:$0xff] }
  0x11   :  { %v78_v10 = vld [vmem:[%s3814_s8] sm:$0xff]  ;;  %v79_v15 = vld [vmem:[%s3814_s8 + $0x8] sm:$0xff]  ;;  %v80_v19 = vld [vmem:[%s3814_s8 + $0x10] sm:$0xff] }
  0x12   :  { %183 = vmatpush.msra.mxu0 %v148_v5  ;;  %v113_v11 = vld [vmem:[%s3815_s26] sm:$0xff]  ;;  %v114_v16 = vld [vmem:[%s3815_s26 + $0x8] sm:$0xff]  ;;  %v115_v23 = vld [vmem:[%s3815_s26 + $0x10] sm:$0xff] }
  0x13   :  { %v81_v25 = vld [vmem:[%s3814_s8 + $0x18] sm:$0xff]  ;;  %v82_v29 = vld [vmem:[%s3814_s8 + $0x20] sm:$0xff] }
  0x14   :  { %184 = vmatpush.msra.mxu0 %v147_v8  ;;  %v116_v28 = vld [vmem:[%s3815_s26 + $0x18] sm:$0xff]  ;;  %v117_v33 = vld [vmem:[%s3815_s26 + $0x20] sm:$0xff] }
  0x15   :  { %v2398_v43 = vld [vmem:[%s3816_s28] ss:$0 sm:$0xff] }
  0x16   :  { %185 = vmatpush.msra.mxu0 %v146_v9  ;;  %v2898_v35 = vld [vmem:[%s3817_s23 + $0x20] sm:$0xff] }
  0x17   :  { %90 = vperm.xlu0 %2290, %v74_v6   ;;  %100 = vperm.xlu1 %2291, %v76_v7  }
  0x6a   :  { %v106_v30 = vpop.permute.xlu2 %105 }
  0x6b   :  { %v112_v32 = vmul.f32 %v106_v30, %v82_v29  ;;  %v2891_v29 = vld [vmem:[%s3817_s23 + $0x18] sm:$0xff] }
  0x6d   :  { %v2730_v34 = vadd.f32 %v117_v33, %v112_v32 }
  0x81   :  { %v86_v12 = vpop.permute.xlu0 %85  ;;  %v96_v20 = vpop.permute.xlu1 %95 }
  0x82   :  { %v108_v13 = vmul.f32 %v86_v12, %v78_v10  ;;  %v110_v22 = vmul.f32 %v96_v20, %v80_v19  ;;  %v2877_v19 = vld [vmem:[%s3817_s23 + $0x8] sm:$0xff] }
  0x84   :  { %v2690_v14 = vadd.f32 %v113_v11, %v108_v13  ;;  %v2710_v24 = vadd.f32 %v115_v23, %v110_v22 }
  0x86   :  { %2138 = vmatmul.msk.f32.vlgmr.msra.gmra.mxu0 %vm154_vm0, %v2690_v14 }
  0x89   :  { %v91_v17 = vpop.permute.xlu0 %90  ;;  %v101_v26 = vpop.permute.xlu1 %100 }
  0x8a   :  { %v109_v18 = vmul.f32 %v91_v17, %v79_v15  ;;  %v111_v27 = vmul.f32 %v101_v26, %v81_v25  ;;  %v2870_v15 = vld [vmem:[%s3817_s23] sm:$0xff]  ;;  %v2884_v25 = vld [vmem:[%s3817_s23 + $0x10] sm:$0xff]  ;;  %s3818_s23 = sld [smem:[#allocation9_spill]] }
  0x8c   :  { %v2703_v21 = vadd.f32 %v114_v16, %v109_v18  ;;  %v2723_v31 = vadd.f32 %v116_v28, %v111_v27 }
  0x8e   :  { %2139 = vmatmul.msk.f32.gmra.mxu0 %vm154_vm0, %v2703_v21 }
  0x96   :  { %2140 = vmatmul.msk.f32.gmra.mxu0 %vm154_vm0, %v2710_v24 }
  0x9e   :  { %2141 = vmatmul.msk.f32.gmra.mxu0 %vm154_vm0, %v2723_v31 }
  0xa6   :  { %2142 = vmatmul.msk.f32.gmra.mxu0 %vm154_vm0, %v2730_v34 }
 0x103   :  { %v187_v41 = vpop.f32.mrf.mxu0 }
 0x104   :  { %v2751_v49 = vadd.f32 %v2398_v43, %v187_v41 }
 0x106   :  { %v2792_v57 = vmul.f32 0.35355338, %v2751_v49 }
 0x108   :  { %v212_v59 = vmul.f32 %v2734_v38, %v2792_v57  ;;  %v354_v60 = vmul.f32 %v2761_v52, %v2792_v57  ;;  %v792_v9 = vmul.f32 %v2736_v39, %v2792_v57 }
 0x10b   :  { %v190_v42 = vpop.f32.mrf.mxu0 }
 0x10c   :  { %v2759_v51 = vadd.f32 %v2398_v43, %v190_v42 }
 0x10e   :  { %v2811_v61 = vmul.f32 0.35355338, %v2759_v51 }
 0x110   :  { %v213_v62 = vmul.f32 %v2734_v38, %v2811_v61  ;;  %v355_v63 = vmul.f32 %v2761_v52, %v2811_v61  ;;  %v793_v10 = vmul.f32 %v2736_v39, %v2811_v61 }
 0x113   :  { %v193_v44 = vpop.f32.mrf.mxu0 }
 0x114   :  { %v2743_v45 = vadd.f32 %v2398_v43, %v193_v44 }
 0x116   :  { %226 = vrot.lane.b32.xlu1 %v2743_v45, %s2539_s30  ;;  %v2824_v0 = vmul.f32 0.35355338, %v2743_v45 }
 0x118   :  { %v214_v1 = vmul.f32 %v2734_v38, %v2824_v0  ;;  %v356_v2 = vmul.f32 %v2761_v52, %v2824_v0  ;;  %v794_v11 = vmul.f32 %v2736_v39, %v2824_v0 }
 0x11b   :  { %v196_v46 = vpop.f32.mrf.mxu0 }
 0x11c   :  { %v2747_v47 = vadd.f32 %v2398_v43, %v196_v46 }
 0x11e   :  { %228 = vrot.lane.b32.xlu0 %v2747_v47, %s2539_s30  ;;  %v2835_v3 = vmul.f32 0.35355338, %v2747_v47 }
 0x120   :  { %v215_v4 = vmul.f32 %v2734_v38, %v2835_v3  ;;  %v357_v5 = vmul.f32 %v2761_v52, %v2835_v3  ;;  %v795_v12 = vmul.f32 %v2736_v39, %v2835_v3 }
 0x123   :  { %v199_v48 = vpop.f32.mrf.mxu0 }
 0x124   :  { %v2753_v50 = vadd.f32 %v2398_v43, %v199_v48 }
 0x126   :  { %230 = vrot.lane.b32.xlu2 %v2753_v50, %s2539_s30  ;;  %222 = vrot.lane.b32.xlu0 %v2751_v49, %s2539_s30  ;;  %v2844_v6 = vmul.f32 0.35355338, %v2753_v50 }
 0x128   :  { %v216_v7 = vmul.f32 %v2734_v38, %v2844_v6  ;;  %v358_v8 = vmul.f32 %v2761_v52, %v2844_v6  ;;  %v796_v13 = vmul.f32 %v2736_v39, %v2844_v6 }
 0x12e   :  { %462 = vrot.lane.b32.xlu0 %v2761_v52, %s2540_s2  ;;  %224 = vrot.lane.b32.xlu2 %v2759_v51, %s2539_s30 }
 0x180   :  { %v2767_v53 = vpop.permute.xlu2 %230 }
 0x181   :  { %2143 = vmatpush.xpose.msk.msra.mxu1 %vm154_vm0, %v2767_v53  ;;  %2153 = vmatpush.xpose.msk.msra.mxu2 %vm154_vm0, %v2767_v53 }
 0x188   :  { %v2779_v55 = vpop.permute.xlu1 %226  ;;  %v2785_v56 = vpop.permute.xlu2 %224 }
 0x190   :  { %v2773_v54 = vpop.permute.xlu0 %228 }
 0x191   :  { %2144 = vmatpush.xpose.msk.msra.mxu1 %vm154_vm0, %v2773_v54  ;;  %2154 = vmatpush.xpose.msk.msra.mxu2 %vm154_vm0, %v2773_v54 }
 0x195   :  { %2145 = vmatpush.xpose.msk.msra.mxu1 %vm154_vm0, %v2779_v55  ;;  %2155 = vmatpush.xpose.msk.msra.mxu2 %vm154_vm0, %v2779_v55 }
 0x198   :  { %v2794_v58 = vpop.permute.xlu0 %222 }
 0x199   :  { %2146 = vmatpush.xpose.msk.msra.mxu1 %vm154_vm0, %v2785_v56  ;;  %2156 = vmatpush.xpose.msk.msra.mxu2 %vm154_vm0, %v2785_v56 }
 0x19d   :  { %2147 = vmatpush.xpose.msk.msra.mxu1 %vm154_vm0, %v2794_v58  ;;  %2157 = vmatpush.xpose.msk.msra.mxu2 %vm154_vm0, %v2794_v58 }
 0x1a0   :  { %2148 = vmatmul.msk.f32.vlgmr.msra.gmra.mxu1 %vm154_vm0, %v212_v59  ;;  %2158 = vmatmul.msk.f32.vlgmr.msra.gmra.mxu2 %vm154_vm0, %v354_v60  ;;  %v2902_v42 = vpop.permute.xlu0 %462 }
 0x1a1   :  { %2188 = vmatpush.xpose.msk.msrb.mxu2 %vm154_vm0, %v2767_v53  ;;  %v468_v43 = vmul.f32 %v2902_v42, %v2747_v47  ;;  %v469_v44 = vmul.f32 %v2902_v42, %v2753_v50 }
 0x1a3   :  { %v2293_v46 = vpack.i.bf16 %v468_v43, %v469_v44 }
 0x1a5   :  { %2189 = vmatpush.xpose.msk.msrb.mxu2 %vm154_vm0, %v2773_v54 }
 0x1a8   :  { %2149 = vmatmul.msk.f32.gmra.mxu1 %vm154_vm0, %v213_v62  ;;  %2159 = vmatmul.msk.f32.gmra.mxu2 %vm154_vm0, %v355_v63 }
 0x1a9   :  { %2190 = vmatpush.xpose.msk.msrb.mxu2 %vm154_vm0, %v2779_v55 }
 0x1ad   :  { %2191 = vmatpush.xpose.msk.msrb.mxu2 %vm154_vm0, %v2785_v56 }
 0x1b0   :  { %2150 = vmatmul.msk.f32.gmra.mxu1 %vm154_vm0, %v214_v1  ;;  %2160 = vmatmul.msk.f32.gmra.mxu2 %vm154_vm0, %v356_v2 }
 0x1b1   :  { %2192 = vmatpush.xpose.msk.msrb.mxu2 %vm154_vm0, %v2794_v58 }
 0x1b8   :  { %2151 = vmatmul.msk.f32.gmra.mxu1 %vm154_vm0, %v215_v4  ;;  %2161 = vmatmul.msk.f32.gmra.mxu2 %vm154_vm0, %v357_v5 }
 0x1c0   :  { %2152 = vmatmul.msk.f32.gmra.mxu1 %vm154_vm0, %v216_v7  ;;  %2162 = vmatmul.msk.f32.gmra.mxu2 %vm154_vm0, %v358_v8 }
 0x1c8   :  { %2193 = vmatmul.msk.f32.vlgmr.msrb.gmra.mxu2 %vm154_vm0, %v792_v9 }
 0x1d0   :  { %2194 = vmatmul.msk.f32.gmra.mxu2 %vm154_vm0, %v793_v10 }
 0x1d8   :  { %2195 = vmatmul.msk.f32.gmra.mxu2 %vm154_vm0, %v794_v11 }
 0x1e0   :  { %2196 = vmatmul.msk.f32.gmra.mxu2 %vm154_vm0, %v795_v12 }
 0x1e8   :  { %2197 = vmatmul.msk.f32.gmra.mxu2 %vm154_vm0, %v796_v13 }
 0x21d   :  { %v274_v13 = vpop.f32.mrf.mxu1 }
 0x223   :  { %v391_v16 = vpop.f32.mrf.mxu2 }
 0x224   :  { %v392_v17 = vadd.f32 %v391_v16, %v2870_v15  ;;  %v466_v16 = vmul.f32 %v2902_v42, %v2759_v51 }
 0x225   :  { %v277_v43 = vpop.f32.mrf.mxu1 }
 0x226   :  { %v406_v18 = vsel %vm289_vm11, %v392_v17, -inf }
 0x227   :  { %407 = vmax.xlane.f32.xlu1 %v406_v18  ;;  %v2926_v18 = vadd.f32 %v274_v13, %v2870_v15 }
 0x22b   :  { %v394_v20 = vpop.f32.mrf.mxu2 }
 0x22c   :  { %v395_v22 = vadd.f32 %v394_v20, %v2877_v19 }
 0x22e   :  { %v409_v23 = vsel %vm289_vm11, %v395_v22, -inf }
 0x22f   :  { %410 = vmax.xlane.f32.xlu2 %v409_v23  ;;  %v465_v23 = vmul.f32 %v2902_v42, %v2751_v49 }
 0x233   :  { %v397_v26 = vpop.f32.mrf.mxu2 }
 0x234   :  { %v398_v27 = vadd.f32 %v397_v26, %v2884_v25 }
 0x236   :  { %v412_v28 = vsel %vm289_vm11, %v398_v27, -inf }
 0x237   :  { %413 = vmax.xlane.f32.xlu0 %v412_v28 }
 0x23b   :  { %v400_v30 = vpop.f32.mrf.mxu2 }
 0x23c   :  { %v401_v32 = vadd.f32 %v400_v30, %v2891_v29 }
 0x23e   :  { %v415_v33 = vsel %vm289_vm11, %v401_v32, -inf }
 0x23f   :  { %416 = vmax.xlane.f32.xlu2 %v415_v33  ;;  %v2303_v33 = vpack.i.bf16 %v2738_v40, %v2734_v38 }
 0x243   :  { %v403_v36 = vpop.f32.mrf.mxu2 }
 0x244   :  { %v404_v37 = vadd.f32 %v403_v36, %v2898_v35 }
 0x246   :  { %v418_v41 = vsel %vm289_vm11, %v404_v37, -inf }
 0x247   :  { %419 = vmax.xlane.f32.xlu1 %v418_v41 }
 0x260   :  { %2294 = vrot.lane.b32.xlu1 %v2293_v46, %s2540_s2 }
 0x29a   :  { %v408_v48 = vpop.xlane.xlu1 %407 }
 0x29b   :  { %v421_v59 = vsub.f32 %v392_v17, %v408_v48  ;;  %v467_v17 = vmul.f32 %v2902_v42, %v2743_v45 }
 0x29d   :  { %v426_v60 = vmul.f32 1.442695, %v421_v59  ;;  %v2298_v20 = vpack.i.bf16 %v466_v16, %v467_v17  ;;  %v280_v59 = vpop.f32.mrf.mxu1 }
 0x29f   :  { %2415 = vpow2.f32 %v426_v60 }
 0x2a2   :  { %v411_v62 = vpop.xlane.xlu2 %410 }
 0x2a3   :  { %v422_v63 = vsub.f32 %v395_v22, %v411_v62  ;;  %v290_v22 = vsel %vm289_vm11, %v2926_v18, -inf }
 0x2a5   :  { %v2909_v1 = vpop.eup %2415  ;;  %v428_v2 = vmul.f32 1.442695, %v422_v63 }
 0x2a6   :  { %v436_v4 = vsel %vm289_vm11, %v2909_v1, 0.0 }
 0x2a7   :  { %2417 = vpow2.f32 %v428_v2  ;;  %437 = vadd.xlane.f32.xlu2 %v436_v4  ;;  %v283_v2 = vpop.f32.mrf.mxu1 }
 0x2aa   :  { %v414_v5 = vpop.xlane.xlu0 %413 }
 0x2ab   :  { %v423_v7 = vsub.f32 %v398_v27, %v414_v5  ;;  %v2951_v5 = vadd.f32 %v280_v59, %v2884_v25 }
 0x2ad   :  { %v2913_v8 = vpop.eup %2417  ;;  %v430_v9 = vmul.f32 1.442695, %v423_v7  ;;  %v829_v7 = vpop.f32.mrf.mxu2 }
 0x2ae   :  { %v439_v10 = vsel %vm289_vm11, %v2913_v8, 0.0 }
 0x2af   :  { %2419 = vpow2.f32 %v430_v9  ;;  %440 = vadd.xlane.f32.xlu0 %v439_v10  ;;  %v2954_v9 = vadd.f32 %v283_v2, %v2891_v29  ;;  %v296_v10 = vsel %vm289_vm11, %v2951_v5, -inf }
 0x2b1   :  { %v299_v13 = vsel %vm289_vm11, %v2954_v9, -inf }
 0x2b2   :  { %v417_v28 = vpop.xlane.xlu2 %416 }
 0x2b3   :  { %v424_v41 = vsub.f32 %v401_v32, %v417_v28  ;;  %v2944_v32 = vadd.f32 %v277_v43, %v2877_v19 }
 0x2b5   :  { %v2917_v11 = vpop.eup %2419  ;;  %v432_v44 = vmul.f32 1.442695, %v424_v41  ;;  %v832_v17 = vpop.f32.mrf.mxu2 }
 0x2b6   :  { %v442_v12 = vsel %vm289_vm11, %v2917_v11, 0.0 }
 0x2b7   :  { %443 = vadd.xlane.f32.xlu1 %v442_v12  ;;  %2421 = vpow2.f32 %v432_v44  ;;  %v286_v12 = vpop.f32.mrf.mxu1 }
 0x2b8   :  { %v2961_v16 = vadd.f32 %v286_v12, %v2898_v35 }
 0x2ba   :  { %v420_v26 = vpop.xlane.xlu1 %419 }
 0x2bb   :  { %v425_v46 = vsub.f32 %v404_v37, %v420_v26  ;;  %v293_v37 = vsel %vm289_vm11, %v2944_v32, -inf }
 0x2bd   :  { %v434_v48 = vmul.f32 1.442695, %v425_v46  ;;  %v2937_v60 = vpop.eup %2421 }
 0x2be   :  { %v445_v62 = vsel %vm289_vm11, %v2937_v60, 0.0 }
 0x2bf   :  { %291 = vmax.xlane.f32.xlu1 %v290_v22  ;;  %2299 = vrot.lane.b32.xlu2 %v2298_v20, %s2540_s2  ;;  %2423 = vpow2.f32 %v434_v48  ;;  %v302_v20 = vsel %vm289_vm11, %v2961_v16, -inf  ;;  %v2966_v22 = vadd.f32 %v832_v17, %v2877_v19 }
 0x2c1   :  { %v847_v26 = vsel %vm289_vm11, %v2966_v22, -inf }
 0x2c3   :  { %475 = vrot.lane.b32.xlu0 %v465_v23, %s2540_s2  ;;  %v2969_v23 = vadd.f32 %v829_v7, %v2870_v15 }
 0x2c5   :  { %v2941_v63 = vpop.eup %2423 }
 0x2c6   :  { %v448_v4 = vsel %vm289_vm11, %v2941_v63, 0.0 }
 0x2d2   :  { %v2295_v27 = vpop.permute.xlu1 %2294 }
 0x2d3   :  { %v2296_v30 = vunpack.i.l.bf16 %v2295_v27  ;;  %v2297_v36 = vunpack.i.h.bf16 %v2295_v27  ;;  %v844_v27 = vsel %vm289_vm11, %v2969_v23, -inf }
 0x2d5   :  { %516 = vmatpush.msra.mxu3 %v2296_v30 }
 0x2d7   :  { %517 = vmatpush.msra.mxu3 %v2297_v36 }
 0x2d8   :  { %2304 = vrot.lane.b32.xlu1 %v2303_v33, %s2540_s2 }
 0x2e8   :  { %446 = vadd.xlane.f32.xlu2 %v445_v62 }
 0x2ed   :  { %449 = vadd.xlane.f32.xlu0 %v448_v4 }
 0x2f0   :  { %294 = vmax.xlane.f32.xlu2 %v293_v37 }
 0x2f5   :  { %297 = vmax.xlane.f32.xlu0 %v296_v10 }
 0x2f8   :  { %300 = vmax.xlane.f32.xlu2 %v299_v13 }
 0x2fd   :  { %303 = vmax.xlane.f32.xlu0 %v302_v20 }
 0x302   :  { %848 = vmax.xlane.f32.xlu1 %v847_v26 }
 0x305   :  { %845 = vmax.xlane.f32.xlu0 %v844_v27 }
 0x31a   :  { %v438_v28 = vpop.xlane.xlu2 %437 }
 0x31b   :  { %2425 = vrcp.f32 %v438_v28 }
 0x321   :  { %v2426_v44 = vpop.eup %2425 }
 0x322   :  { %v2300_v30 = vpop.permute.xlu2 %2299  ;;  %v441_v43 = vpop.xlane.xlu0 %440  ;;  %v456_v2 = vmul.f32 %v2426_v44, %v2909_v1 }
 0x323   :  { %v2301_v33 = vunpack.i.l.bf16 %v2300_v30  ;;  %v2302_v36 = vunpack.i.h.bf16 %v2300_v30  ;;  %2427 = vrcp.f32 %v441_v43 }
 0x325   :  { %518 = vmatpush.msra.mxu3 %v2301_v33 }
 0x327   :  { %519 = vmatpush.msra.mxu3 %v2302_v36  ;;  %v835_v36 = vpop.f32.mrf.mxu2 }
 0x329   :  { %v2428_v4 = vpop.eup %2427 }
 0x32a   :  { %v444_v41 = vpop.xlane.xlu1 %443 }
 0x332   :  { %v292_v46 = vpop.xlane.xlu1 %291 }
 0x333   :  { %v305_v48 = vsub.f32 %v2926_v18, %v292_v46  ;;  %v457_v18 = vmul.f32 %v2428_v4, %v2913_v8 }
 0x335   :  { %v310_v59 = vmul.f32 1.442695, %v305_v48  ;;  %v476_v62 = vpop.permute.xlu0 %475 }
 0x336   :  { %520 = vmatpush.msra.mxu3 %v476_v62  ;;  %v838_v62 = vpop.f32.mrf.mxu2 }
 0x337   :  { %2429 = vpow2.f32 %v310_v59  ;;  %2163 = vmatmul.msk.f32.vlgmr.msra.gmra.mxu3 %vm289_vm11, %v456_v2  ;;  %v3026_v4 = vadd.f32 %v838_v62, %v2891_v29 }
 0x338   :  { %2173 = vmatpush.xpose.msk.msrb.mxu3 %vm154_vm0, %v2767_v53  ;;  %2431 = vrcp.f32 %v444_v41 }
 0x33c   :  { %2174 = vmatpush.xpose.msk.msrb.mxu3 %vm154_vm0, %v2773_v54 }
 0x33d   :  { %v2982_v37 = vpop.eup %2429 }
 0x33e   :  { %v320_v7 = vsel %vm289_vm11, %v2982_v37, 0.0  ;;  %v2432_v1 = vpop.eup %2431 }
 0x33f   :  { %2164 = vmatmul.msk.f32.gmra.mxu3 %vm289_vm11, %v457_v18  ;;  %321 = vadd.xlane.f32.xlu0 %v320_v7  ;;  %v458_v53 = vmul.f32 %v2432_v1, %v2917_v11  ;;  %v3031_v7 = vadd.f32 %v835_v36, %v2884_v25  ;;  %v853_v1 = vsel %vm289_vm11, %v3026_v4, -inf  ;;  %v608_v36 = vmul.f32 %v2738_v40, %v2844_v6 }
 0x340   :  { %2175 = vmatpush.xpose.msk.msrb.mxu3 %vm154_vm0, %v2779_v55 }
 0x344   :  { %2176 = vmatpush.xpose.msk.msrb.mxu3 %vm154_vm0, %v2785_v56 }
 0x347   :  { %2165 = vmatmul.msk.f32.gmra.mxu3 %vm289_vm11, %v458_v53 }
 0x348   :  { %2177 = vmatpush.xpose.msk.msrb.mxu3 %vm154_vm0, %v2794_v58 }
 0x34a   :  { %v2996_v54 = vpop.permute.xlu1 %2304 }
 0x34b   :  { %v2999_v8 = vunpack.i.l.bf16 %v2996_v54 }
 0x34d   :  { %v353_v10 = vmul.f32 %v2999_v8, %v2753_v50  ;;  %v351_v55 = vmul.f32 %v2999_v8, %v2743_v45  ;;  %v352_v56 = vmul.f32 %v2999_v8, %v2747_v47  ;;  %v349_v58 = vmul.f32 %v2999_v8, %v2751_v49 }
 0x34e   :  { %v350_v13 = vmul.f32 %v2999_v8, %v2759_v51 }
 0x34f   :  { %v2308_v11 = vpack.i.bf16 %v353_v10, %v2736_v39  ;;  %v2313_v12 = vpack.i.bf16 %v351_v55, %v352_v56  ;;  %v841_v56 = vpop.f32.mrf.mxu2 }
 0x350   :  { %v2318_v17 = vpack.i.bf16 %v349_v58, %v350_v13  ;;  %v605_v58 = vmul.f32 %v2738_v40, %v2811_v61 }
 0x351   :  { %2309 = vrot.lane.b32.xlu2 %v2308_v11, %s2540_s2 }
 0x353   :  { %2314 = vrot.lane.b32.xlu0 %v2313_v12, %s2540_s2 }
 0x35b   :  { %v447_v20 = vpop.xlane.xlu2 %446  ;;  %2319 = vrot.lane.b32.xlu0 %v2318_v17, %s2540_s2  ;;  %v3046_v17 = vadd.f32 %v841_v56, %v2898_v35 }
 0x35c   :  { %2433 = vrcp.f32 %v447_v20  ;;  %v606_v20 = vmul.f32 %v2738_v40, %v2824_v0  ;;  %v607_v0 = vmul.f32 %v2738_v40, %v2835_v3 }
 0x360   :  { %v450_v26 = vpop.xlane.xlu0 %449 }
 0x361   :  { %2435 = vrcp.f32 %v450_v26 }
 0x362   :  { %v2434_v27 = vpop.eup %2433 }
 0x363   :  { %v295_v28 = vpop.xlane.xlu2 %294  ;;  %v459_v30 = vmul.f32 %v2434_v27, %v2937_v60 }
 0x364   :  { %v306_v33 = vsub.f32 %v2944_v32, %v295_v28 }
 0x365   :  { %2166 = vmatmul.msk.f32.gmra.mxu3 %vm289_vm11, %v459_v30 }
 0x366   :  { %v312_v41 = vmul.f32 1.442695, %v306_v33 }
 0x367   :  { %v2436_v43 = vpop.eup %2435 }
 0x368   :  { %2437 = vpow2.f32 %v312_v41  ;;  %v298_v44 = vpop.xlane.xlu0 %297  ;;  %v460_v46 = vmul.f32 %v2436_v43, %v2941_v63  ;;  %v604_v63 = vmul.f32 %v2738_v40, %v2792_v57  ;;  %v850_v57 = vsel %vm289_vm11, %v3031_v7, -inf }
 0x369   :  { %v307_v59 = vsub.f32 %v2951_v5, %v298_v44  ;;  %v3075_v41 = vunpack.i.h.bf16 %v2996_v54 }
 0x36b   :  { %v314_v2 = vmul.f32 1.442695, %v307_v59  ;;  %v301_v18 = vpop.xlane.xlu2 %300  ;;  %v718_v43 = vmul.f32 %v3075_v41, %v2747_v47  ;;  %v719_v44 = vmul.f32 %v3075_v41, %v2753_v50 }
 0x36c   :  { %v308_v5 = vsub.f32 %v2954_v9, %v301_v18 }
 0x36d   :  { %2167 = vmatmul.msk.f32.gmra.mxu3 %vm289_vm11, %v460_v46  ;;  %2439 = vpow2.f32 %v314_v2  ;;  %v2323_v46 = vpack.i.bf16 %v718_v43, %v719_v44 }
 0x36e   :  { %v3020_v48 = vpop.eup %2437  ;;  %v316_v11 = vmul.f32 1.442695, %v308_v5 }
 0x36f   :  { %v323_v60 = vsel %vm289_vm11, %v3020_v48, 0.0 }
 0x370   :  { %v304_v32 = vpop.xlane.xlu0 %303  ;;  %324 = vadd.xlane.f32.xlu1 %v323_v60 }
 0x371   :  { %v309_v53 = vsub.f32 %v2961_v16, %v304_v32 }
 0x373   :  { %v3043_v9 = vpop.eup %2439  ;;  %v318_v13 = vmul.f32 1.442695, %v309_v53 }
 0x374   :  { %v326_v16 = vsel %vm289_vm11, %v3043_v9, 0.0 }
 0x375   :  { %2178 = vmatmul.msk.f32.vlgmr.msrb.gmra.mxu3 %vm154_vm0, %v604_v63 }
 0x378   :  { %v846_v10 = vpop.xlane.xlu0 %845  ;;  %854 = vmax.xlane.f32.xlu1 %v853_v1 }
 0x379   :  { %v859_v55 = vsub.f32 %v2969_v23, %v846_v10  ;;  %v856_v23 = vsel %vm289_vm11, %v3046_v17, -inf  ;;  %v3091_v10 = vpop.xlane.xlu1 %848 }
 0x37a   :  { %851 = vmax.xlane.f32.xlu2 %v850_v57 }
 0x37b   :  { %v864_v12 = vmul.f32 1.442695, %v859_v55 }
 0x37d   :  { %2441 = vpow2.f32 %v864_v12  ;;  %2179 = vmatmul.msk.f32.gmra.mxu3 %vm154_vm0, %v605_v58 }
 0x37e   :  { %2443 = vpow2.f32 %v316_v11 }
 0x37f   :  { %2445 = vpow2.f32 %v318_v13 }
 0x380   :  { %327 = vadd.xlane.f32.xlu1 %v326_v16 }
 0x382   :  { %857 = vmax.xlane.f32.xlu2 %v856_v23 }
 0x383   :  { %v3053_v61 = vpop.eup %2441 }
 0x384   :  { %v3057_v26 = vpop.eup %2443  ;;  %v874_v27 = vsel %vm289_vm11, %v3053_v61, 0.0 }
 0x385   :  { %2180 = vmatmul.msk.f32.gmra.mxu3 %vm154_vm0, %v606_v20  ;;  %875 = vadd.xlane.f32.xlu0 %v874_v27  ;;  %v3062_v28 = vpop.eup %2445  ;;  %v329_v30 = vsel %vm289_vm11, %v3057_v26, 0.0 }
 0x386   :  { %v332_v33 = vsel %vm289_vm11, %v3062_v28, 0.0 }
 0x388   :  { %330 = vadd.xlane.f32.xlu1 %v329_v30 }
 0x38a   :  { %333 = vadd.xlane.f32.xlu2 %v332_v33 }
 0x38d   :  { %2181 = vmatmul.msk.f32.gmra.mxu3 %vm154_vm0, %v607_v0 }
 0x395   :  { %2182 = vmatmul.msk.f32.gmra.mxu3 %vm154_vm0, %v608_v36 }
 0x3a2   :  { %2324 = vrot.lane.b32.xlu2 %v2323_v46, %s2540_s2 }
 0x3ab   :  { %v3082_v3 = vpop.permute.xlu2 %2309 }
 0x3ac   :  { %v2312_v59 = vunpack.i.h.bf16 %v3082_v3 }
 0x3ae   :  { %583 = vmatpush.msrb.mxu0 %v2312_v59 }
 0x3b2   :  { %v322_v6 = vpop.xlane.xlu0 %321 }
 0x3b3   :  { %2447 = vrcp.f32 %v322_v6 }
 0x3b9   :  { %v2448_v18 = vpop.eup %2447 }
 0x3ba   :  { %v3085_v32 = vpop.f32.mrf.mxu3  ;;  %v340_v1 = vmul.f32 %v2448_v18, %v2982_v37 }
 0x3c2   :  { %v3089_v53 = vpop.f32.mrf.mxu3 }
 0x3c5   :  { %v2315_v60 = vpop.permute.xlu0 %2314 }
 0x3c6   :  { %v2316_v62 = vunpack.i.l.bf16 %v2315_v60  ;;  %v2317_v54 = vunpack.i.h.bf16 %v2315_v60 }
 0x3c8   :  { %584 = vmatpush.msrb.mxu0 %v2316_v62 }
 0x3ca   :  { %585 = vmatpush.msrb.mxu0 %v2317_v54  ;;  %v3093_v55 = vpop.f32.mrf.mxu3 }
 0x3cd   :  { %v2320_v2 = vpop.permute.xlu0 %2319 }
 0x3ce   :  { %v2321_v63 = vunpack.i.l.bf16 %v2320_v2  ;;  %v2322_v5 = vunpack.i.h.bf16 %v2320_v2 }
 0x3d0   :  { %586 = vmatpush.msrb.mxu0 %v2321_v63 }
 0x3d2   :  { %587 = vmatpush.msrb.mxu0 %v2322_v5  ;;  %v3121_v5 = vunpack.i.l.bf16 %v3082_v3 }
 0x3d3   :  { %2168 = vmatmul.msk.f32.vlgmr.msrb.gmra.mxu0 %vm289_vm11, %v340_v1 }
 0x3d4   :  { %v906_v3 = vmul.f32 %v3121_v5, %v2747_v47  ;;  %v717_v47 = vmul.f32 %v3075_v41, %v2743_v45 }
 0x3e3   :  { %v325_v57 = vpop.xlane.xlu1 %324 }
 0x3e4   :  { %2449 = vrcp.f32 %v325_v57 }
 0x3e8   :  { %v3095_v56 = vpop.f32.mrf.mxu3 }
 0x3ea   :  { %v2450_v11 = vpop.eup %2449 }
 0x3eb   :  { %v3097_v12 = vpop.xlane.xlu1 %854  ;;  %v341_v58 = vmul.f32 %v2450_v11, %v3020_v48  ;;  %v715_v11 = vmul.f32 %v3075_v41, %v2751_v49 }
 0x3ed   :  { %v3100_v13 = vpop.xlane.xlu2 %851  ;;  %2169 = vmatmul.msk.f32.gmra.mxu0 %vm289_vm11, %v341_v58 }
 0x3f0   :  { %v3103_v37 = vpop.f32.mrf.mxu3 }
 0x3f3   :  { %v328_v16 = vpop.xlane.xlu1 %327 }
 0x3f4   :  { %2451 = vrcp.f32 %v328_v16  ;;  %v716_v16 = vmul.f32 %v3075_v41, %v2759_v51 }
 0x3f5   :  { %v3105_v23 = vpop.xlane.xlu2 %857 }
 0x3f8   :  { %v641_v20 = vpop.f32.mrf.mxu3 }
 0x3f9   :  { %v642_v27 = vadd.f32 %v641_v20, %v2870_v15  ;;  %v2333_v20 = vpack.i.bf16 %v716_v16, %v906_v3 }
 0x3fa   :  { %v2452_v30 = vpop.eup %2451 }
 0x3fb   :  { %v331_v33 = vpop.xlane.xlu1 %330  ;;  %v656_v0 = vsel %vm289_vm11, %v642_v27, -inf  ;;  %v342_v36 = vmul.f32 %v2452_v30, %v3043_v9  ;;  %v904_v30 = vmul.f32 %v3121_v5, %v2759_v51 }
 0x3fc   :  { %2453 = vrcp.f32 %v331_v33  ;;  %657 = vmax.xlane.f32.xlu2 %v656_v0  ;;  %v907_v0 = vmul.f32 %v3121_v5, %v2753_v50 }
 0x3fd   :  { %v334_v48 = vpop.xlane.xlu2 %333  ;;  %2170 = vmatmul.msk.f32.gmra.mxu0 %vm289_vm11, %v342_v36  ;;  %v860_v36 = vsub.f32 %v2966_v22, %v3091_v10  ;;  %v861_v22 = vsub.f32 %v3031_v7, %v3100_v13 }
 0x3fe   :  { %2455 = vrcp.f32 %v334_v48  ;;  %v2328_v48 = vpack.i.bf16 %v717_v47, %v907_v0 }
 0x400   :  { %v644_v43 = vpop.f32.mrf.mxu3 }
 0x401   :  { %v645_v44 = vadd.f32 %v644_v43, %v2877_v19  ;;  %v866_v43 = vmul.f32 1.442695, %v860_v36 }
 0x402   :  { %v2454_v46 = vpop.eup %2453 }
 0x403   :  { %v659_v59 = vsel %vm289_vm11, %v645_v44, -inf  ;;  %v343_v15 = vmul.f32 %v2454_v46, %v3057_v26  ;;  %2457 = vpow2.f32 %v866_v43 }
 0x404   :  { %660 = vmax.xlane.f32.xlu2 %v659_v59  ;;  %v2456_v9 = vpop.eup %2455 }
 0x405   :  { %v2325_v6 = vpop.permute.xlu2 %2324  ;;  %2171 = vmatmul.msk.f32.gmra.mxu0 %vm289_vm11, %v343_v15  ;;  %v344_v18 = vmul.f32 %v2456_v9, %v3062_v28  ;;  %v876_v15 = vpop.xlane.xlu0 %875 }
 0x406   :  { %v2326_v60 = vunpack.i.l.bf16 %v2325_v6  ;;  %v2327_v54 = vunpack.i.h.bf16 %v2325_v6 }
 0x408   :  { %v647_v62 = vpop.f32.mrf.mxu3  ;;  %766 = vmatpush.msrb.mxu1 %v2326_v60 }
 0x409   :  { %v648_v2 = vadd.f32 %v647_v62, %v2884_v25  ;;  %v905_v25 = vmul.f32 %v3121_v5, %v2743_v45  ;;  %v868_v62 = vmul.f32 1.442695, %v861_v22 }
 0x40a   :  { %767 = vmatpush.msrb.mxu1 %v2327_v54 }
 0x40b   :  { %v662_v19 = vsel %vm289_vm11, %v648_v2, -inf  ;;  %v2338_v58 = vpack.i.bf16 %v715_v11, %v905_v25 }
 0x40c   :  { %663 = vmax.xlane.f32.xlu0 %v662_v19 }
 0x40d   :  { %2172 = vmatmul.msk.f32.gmra.mxu0 %vm289_vm11, %v344_v18  ;;  %v862_v18 = vsub.f32 %v3026_v4, %v3097_v12 }
 0x40f   :  { %v870_v7 = vmul.f32 1.442695, %v862_v18 }
 0x410   :  { %v650_v26 = vpop.f32.mrf.mxu3 }
 0x411   :  { %v651_v63 = vadd.f32 %v650_v26, %v2891_v29 }
 0x413   :  { %v665_v1 = vsel %vm289_vm11, %v651_v63, -inf }
 0x414   :  { %666 = vmax.xlane.f32.xlu0 %v665_v1 }
 0x418   :  { %v653_v57 = vpop.f32.mrf.mxu3 }
 0x419   :  { %v3129_v28 = vadd.f32 %v653_v57, %v2898_v35  ;;  %v903_v35 = vmul.f32 %v3121_v5, %v2751_v49  ;;  %v3151_v49 = vpop.eup %2457 }
 0x41a   :  { %v877_v51 = vsel %vm289_vm11, %v3151_v49, 0.0 }
 0x41b   :  { %v668_v29 = vsel %vm289_vm11, %v3129_v28, -inf  ;;  %v2343_v33 = vpack.i.bf16 %v903_v35, %v904_v30 }
 0x41c   :  { %669 = vmax.xlane.f32.xlu1 %v668_v29  ;;  %2339 = vrot.lane.b32.xlu2 %v2338_v58, %s2540_s2 }
 0x428   :  { %2334 = vrot.lane.b32.xlu0 %v2333_v20, %s2540_s2 }
 0x430   :  { %2344 = vrot.lane.b32.xlu0 %v2343_v33, %s2540_s2 }
 0x435   :  { %2329 = vrot.lane.b32.xlu1 %v2328_v48, %s2540_s2 }
 0x445   :  { %878 = vadd.xlane.f32.xlu2 %v877_v51 }
 0x46f   :  { %v658_v50 = vpop.xlane.xlu2 %657 }
 0x470   :  { %v671_v46 = vsub.f32 %v642_v27, %v658_v50 }
 0x472   :  { %v676_v59 = vmul.f32 1.442695, %v671_v46 }
 0x474   :  { %2459 = vpow2.f32 %v676_v59 }
 0x477   :  { %v661_v45 = vpop.xlane.xlu2 %660 }
 0x478   :  { %v672_v6 = vsub.f32 %v645_v44, %v661_v45 }
 0x47a   :  { %v3155_v60 = vpop.eup %2459  ;;  %v678_v10 = vmul.f32 1.442695, %v672_v6 }
 0x47b   :  { %v686_v9 = vsel %vm289_vm11, %v3155_v60, 0.0 }
 0x47c   :  { %2461 = vpow2.f32 %v678_v10  ;;  %687 = vadd.xlane.f32.xlu1 %v686_v9 }
 0x47d   :  { %2463 = vpow2.f32 %v868_v62 }
 0x47f   :  { %v664_v54 = vpop.xlane.xlu0 %663  ;;  %v2340_v43 = vpop.permute.xlu2 %2339 }
 0x480   :  { %v673_v19 = vsub.f32 %v648_v2, %v664_v54  ;;  %v863_v2 = vsub.f32 %v3046_v17, %v3105_v23  ;;  %v2341_v59 = vunpack.i.l.bf16 %v2340_v43  ;;  %v2342_v45 = vunpack.i.h.bf16 %v2340_v43 }
 0x482   :  { %v3161_v27 = vpop.eup %2461  ;;  %v680_v44 = vmul.f32 1.442695, %v673_v19  ;;  %v872_v58 = vmul.f32 1.442695, %v863_v2 }
 0x483   :  { %v689_v26 = vsel %vm289_vm11, %v3161_v27, 0.0  ;;  %v3167_v1 = vpop.eup %2463 }
 0x484   :  { %2465 = vpow2.f32 %v680_v44  ;;  %690 = vadd.xlane.f32.xlu1 %v689_v26  ;;  %v880_v4 = vsel %vm289_vm11, %v3167_v1, 0.0 }
 0x485   :  { %2467 = vpow2.f32 %v870_v7 }
 0x487   :  { %v667_v13 = vpop.xlane.xlu0 %666 }
 0x488   :  { %v674_v25 = vsub.f32 %v651_v63, %v667_v13 }
 0x48a   :  { %v3169_v57 = vpop.eup %2465  ;;  %v682_v11 = vmul.f32 1.442695, %v674_v25 }
 0x48b   :  { %v692_v12 = vsel %vm289_vm11, %v3169_v57, 0.0  ;;  %v3177_v3 = vpop.eup %2467 }
 0x48c   :  { %2469 = vpow2.f32 %v682_v11  ;;  %881 = vadd.xlane.f32.xlu1 %v880_v4  ;;  %693 = vadd.xlane.f32.xlu0 %v692_v12  ;;  %v883_v23 = vsel %vm289_vm11, %v3177_v3, 0.0 }
 0x48d   :  { %2471 = vpow2.f32 %v872_v58 }
 0x48f   :  { %v670_v29 = vpop.xlane.xlu1 %669 }
 0x490   :  { %v675_v63 = vsub.f32 %v3129_v28, %v670_v29 }
 0x492   :  { %v3180_v16 = vpop.eup %2469  ;;  %v684_v17 = vmul.f32 1.442695, %v675_v63 }
 0x493   :  { %v695_v20 = vsel %vm289_vm11, %v3180_v16, 0.0  ;;  %v3186_v35 = vpop.eup %2471 }
 0x494   :  { %2473 = vpow2.f32 %v684_v17  ;;  %884 = vadd.xlane.f32.xlu1 %v883_v23  ;;  %696 = vadd.xlane.f32.xlu2 %v695_v20  ;;  %v886_v28 = vsel %vm289_vm11, %v3186_v35, 0.0 }
 0x495   :  { %2475 = vrcp.f32 %v876_v15 }
 0x49a   :  { %v3188_v30 = vpop.eup %2473  ;;  %v2335_v0 = vpop.permute.xlu0 %2334 }
 0x49b   :  { %v698_v33 = vsel %vm289_vm11, %v3188_v30, 0.0  ;;  %v2336_v51 = vunpack.i.l.bf16 %v2335_v0  ;;  %v2337_v50 = vunpack.i.h.bf16 %v2335_v0  ;;  %v2476_v6 = vpop.eup %2475  ;;  %v982_v0 = vld [vmem:[%s3818_s23 + $0x10] sm:$0xff] }
 0x49c   :  { %887 = vadd.xlane.f32.xlu2 %v886_v28  ;;  %699 = vadd.xlane.f32.xlu0 %v698_v33  ;;  %v894_v15 = vmul.f32 %v2476_v6, %v3053_v61 }
 0x4a2   :  { %v2345_v46 = vpop.permute.xlu0 %2344 }
 0x4a3   :  { %v2346_v22 = vunpack.i.l.bf16 %v2345_v46  ;;  %v2347_v10 = vunpack.i.h.bf16 %v2345_v46 }
 0x4a7   :  { %v2330_v47 = vpop.permute.xlu1 %2329 }
 0x4a8   :  { %v2331_v36 = vunpack.i.l.bf16 %v2330_v47  ;;  %v2332_v48 = vunpack.i.h.bf16 %v2330_v47 }
 0x4aa   :  { %768 = vmatpush.msrb.mxu1 %v2332_v48  ;;  %954 = vmatpush.msra.mxu0 %v2331_v36 }
 0x4ac   :  { %769 = vmatpush.msrb.mxu1 %v2337_v50  ;;  %955 = vmatpush.msra.mxu0 %v2336_v51 }
 0x4ae   :  { %770 = vmatpush.msrb.mxu1 %v2342_v45  ;;  %956 = vmatpush.msra.mxu0 %v2341_v59 }
 0x4b0   :  { %957 = vmatpush.msra.mxu0 %v2346_v22 }
 0x4b2   :  { %958 = vmatpush.msra.mxu0 %v2347_v10 }
 0x4b3   :  { %2198 = vmatmul.msk.f32.vlgmr.msra.gmra.mxu0 %vm289_vm11, %v894_v15 }
 0x4b8   :  { %v879_v9 = vpop.xlane.xlu2 %878 }
 0x4b9   :  { %2477 = vrcp.f32 %v879_v9 }
 0x4bf   :  { %v2478_v62 = vpop.eup %2477 }
 0x4c0   :  { %v895_v54 = vmul.f32 %v2478_v62, %v3151_v49 }
 0x4c2   :  { %2199 = vmatmul.msk.f32.gmra.mxu0 %vm289_vm11, %v895_v54 }
 0x4ef   :  { %v688_v19 = vpop.xlane.xlu1 %687 }
 0x4f0   :  { %2479 = vrcp.f32 %v688_v19 }
 0x4f6   :  { %v2480_v18 = vpop.eup %2479 }
 0x4f7   :  { %v691_v44 = vpop.xlane.xlu1 %690  ;;  %v706_v26 = vmul.f32 %v2480_v18, %v3155_v60 }
 0x4f8   :  { %2481 = vrcp.f32 %v691_v44 }
 0x4f9   :  { %2183 = vmatmul.msk.f32.vlgmr.msrb.gmra.mxu1 %vm289_vm11, %v706_v26 }
 0x4fe   :  { %v2482_v61 = vpop.eup %2481 }
 0x4ff   :  { %v882_v7 = vpop.xlane.xlu1 %881  ;;  %v694_v13 = vpop.xlane.xlu0 %693  ;;  %v707_v25 = vmul.f32 %v2482_v61, %v3161_v27 }
 0x500   :  { %2483 = vrcp.f32 %v882_v7 }
 0x501   :  { %2485 = vrcp.f32 %v694_v13  ;;  %2184 = vmatmul.msk.f32.gmra.mxu1 %vm289_vm11, %v707_v25 }
 0x506   :  { %v2484_v49 = vpop.eup %2483 }
 0x507   :  { %v2486_v2 = vpop.eup %2485  ;;  %v885_v11 = vpop.xlane.xlu1 %884  ;;  %v896_v12 = vmul.f32 %v2484_v49, %v3167_v1 }
 0x508   :  { %v697_v4 = vpop.xlane.xlu2 %696  ;;  %2487 = vrcp.f32 %v885_v11  ;;  %v708_v60 = vmul.f32 %v2486_v2, %v3169_v57  ;;  %v2399_v2 = vld [vmem:[%s3782_s11] ss:$0 sm:$0xff] }
 0x509   :  { %2489 = vrcp.f32 %v697_v4  ;;  %2200 = vmatmul.msk.f32.gmra.mxu0 %vm289_vm11, %v896_v12 }
 0x50a   :  { %2185 = vmatmul.msk.f32.gmra.mxu1 %vm289_vm11, %v708_v60 }
 0x50e   :  { %v2488_v58 = vpop.eup %2487 }
 0x50f   :  { %v2490_v27 = vpop.eup %2489  ;;  %v700_v63 = vpop.xlane.xlu0 %699  ;;  %v897_v17 = vmul.f32 %v2488_v58, %v3177_v3  ;;  %v983_v3 = vld [vmem:[%s3818_s23 + $0x18] sm:$0xff] }
 0x510   :  { %v888_v29 = vpop.xlane.xlu2 %887  ;;  %v709_v23 = vmul.f32 %v2490_v27, %v3180_v16  ;;  %1015 = vmatpush.msra.mxu3 %v983_v3  ;;  %v589_v16 = vpop.f32.mrf.mxu0 }
 0x511   :  { %2491 = vrcp.f32 %v888_v29  ;;  %2201 = vmatmul.msk.f32.gmra.mxu0 %vm289_vm11, %v897_v17  ;;  %v590_v43 = vadd.f32 %v589_v16, %v3085_v32  ;;  %v2541_v16 = vmov 32.0  }
 0x512   :  { %2493 = vrcp.f32 %v700_v63  ;;  %2186 = vmatmul.msk.f32.gmra.mxu1 %vm289_vm11, %v709_v23  ;;  %1016 = vmatpush.msra.mxu3 %v982_v0 }
 0x513   :  { %2495 = vrcp.f32 %v2541_v16 }
 0x517   :  { %v2492_v1 = vpop.eup %2491 }
 0x518   :  { %v2494_v57 = vpop.eup %2493  ;;  %v898_v20 = vmul.f32 %v2492_v1, %v3186_v35  ;;  %v592_v33 = vpop.f32.mrf.mxu0  ;;  %v981_v35 = vld [vmem:[%s3818_s23 + $0x8] sm:$0xff] }
 0x519   :  { %v710_v28 = vmul.f32 %v2494_v57, %v3188_v30  ;;  %v980_v30 = vld [vmem:[%s3818_s23] sm:$0xff]  ;;  %1017 = vmatpush.msra.mxu3 %v981_v35  ;;  %v593_v45 = vadd.f32 %v592_v33, %v3089_v53  ;;  %v2496_v33 = vpop.eup %2495 }
 0x51a   :  { %2202 = vmatmul.msk.f32.gmra.mxu0 %vm289_vm11, %v898_v20  ;;  %v1058_v0 = vmul.f32 32.0, %v2496_v33  ;;  %vm1062_vm12 = vweird.f32 %v2496_v33 }
 0x51b   :  { %2187 = vmatmul.msk.f32.gmra.mxu1 %vm289_vm11, %v710_v28  ;;  %1018 = vmatpush.msra.mxu3 %v980_v30 }
 0x51c   :  { %v1059_v35 = vsub.f32 1.0, %v1058_v0  ;;  %v3319_v0 = vld [vmem:[%s3783_s12] ss:$0 sm:$0xff] }
 0x520   :  { %v595_v47 = vpop.f32.mrf.mxu0 }
 0x521   :  { %v596_v9 = vadd.f32 %v595_v47, %v3093_v55 }
 0x528   :  { %v598_v36 = vpop.f32.mrf.mxu0 }
 0x529   :  { %v599_v18 = vadd.f32 %v598_v36, %v3095_v56 }
 0x530   :  { %v601_v48 = vpop.f32.mrf.mxu0 }
 0x531   :  { %v602_v7 = vadd.f32 %v601_v48, %v3103_v37 }
 0x538   :  { %v960_v51 = vpop.f32.mrf.mxu0 }
 0x540   :  { %v963_v6 = vpop.f32.mrf.mxu0 }
 0x576   :  { %v772_v50 = vpop.f32.mrf.mxu1 }
 0x577   :  { %v787_v46 = vadd.f32 %v772_v50, %v590_v43 }
 0x579   :  { %v975_v59 = vadd.f32 %v960_v51, %v787_v46 }
 0x57b   :  { %2203 = vmatmul.msk.f32.vlgmr.msra.gmra.mxu3 %vm154_vm0, %v975_v59 }
 0x57e   :  { %v775_v22 = vpop.f32.mrf.mxu1 }
 0x57f   :  { %v788_v10 = vadd.f32 %v775_v22, %v593_v45 }
 0x581   :  { %v976_v15 = vadd.f32 %v963_v6, %v788_v10 }
 0x583   :  { %2204 = vmatmul.msk.f32.gmra.mxu3 %vm154_vm0, %v976_v15 }
 0x586   :  { %v966_v62 = vpop.f32.mrf.mxu0 }
 0x587   :  { %v778_v54 = vpop.f32.mrf.mxu1 }
 0x588   :  { %v789_v19 = vadd.f32 %v778_v54, %v596_v9 }
 0x58a   :  { %v977_v32 = vadd.f32 %v966_v62, %v789_v19 }
 0x58c   :  { %2205 = vmatmul.msk.f32.gmra.mxu3 %vm154_vm0, %v977_v32 }
 0x58e   :  { %v969_v26 = vpop.f32.mrf.mxu0 }
 0x58f   :  { %v781_v44 = vpop.f32.mrf.mxu1 }
 0x590   :  { %v790_v61 = vadd.f32 %v781_v44, %v599_v18 }
 0x592   :  { %v978_v53 = vadd.f32 %v969_v26, %v790_v61 }
 0x594   :  { %2206 = vmatmul.msk.f32.gmra.mxu3 %vm154_vm0, %v978_v53 }
 0x597   :  { %v972_v49 = vpop.f32.mrf.mxu0 }
 0x598   :  { %v784_v13 = vpop.f32.mrf.mxu1 }
 0x599   :  { %v791_v25 = vadd.f32 %v784_v13, %v602_v7 }
 0x59b   :  { %v979_v55 = vadd.f32 %v972_v49, %v791_v25  ;;  %v1178_v25 = vld [vmem:[%s3786_s14 + $0x18] sm:$0xff]  ;;  %v1177_v49 = vld [vmem:[%s3786_s14 + $0x10] sm:$0xff] }
 0x59c   :  { %1210 = vmatpush.msra.mxu1 %v1178_v25 }
 0x59d   :  { %2207 = vmatmul.msk.f32.gmra.mxu3 %vm154_vm0, %v979_v55  ;;  %v1176_v55 = vld [vmem:[%s3786_s14 + $0x8] sm:$0xff] }
 0x59e   :  { %1211 = vmatpush.msra.mxu1 %v1177_v49 }
 0x5a0   :  { %1212 = vmatpush.msra.mxu1 %v1176_v55 }
 0x5fe   :  { %v1020_v11 = vpop.f32.mrf.mxu3 }
 0x5ff   :  { %v1021_v56 = vadd.f32 %v2399_v2, %v1020_v11 }
 0x601   :  { %v3240_v4 = vadd.f32 %v1021_v56, %v2690_v14 }
 0x603   :  { %v1042_v12 = vsel %vm154_vm0, %v3240_v4, 0.0 }
 0x604   :  { %1043 = vadd.xlane.f32.xlu1 %v1042_v12 }
 0x606   :  { %v1023_v37 = vpop.f32.mrf.mxu3 }
 0x607   :  { %v1024_v60 = vadd.f32 %v2399_v2, %v1023_v37 }
 0x609   :  { %v3245_v58 = vadd.f32 %v1024_v60, %v2703_v21 }
 0x60b   :  { %v1045_v27 = vsel %vm154_vm0, %v3245_v58, 0.0 }
 0x60c   :  { %1046 = vadd.xlane.f32.xlu0 %v1045_v27 }
 0x60f   :  { %v1026_v29 = vpop.f32.mrf.mxu3 }
 0x610   :  { %v1027_v63 = vadd.f32 %v2399_v2, %v1026_v29 }
 0x612   :  { %v3250_v17 = vadd.f32 %v1027_v63, %v2710_v24 }
 0x614   :  { %v1048_v14 = vsel %vm154_vm0, %v3250_v17, 0.0 }
 0x615   :  { %1049 = vadd.xlane.f32.xlu2 %v1048_v14 }
 0x617   :  { %v1029_v23 = vpop.f32.mrf.mxu3 }
 0x618   :  { %v1030_v1 = vadd.f32 %v2399_v2, %v1029_v23 }
 0x61a   :  { %v3255_v57 = vadd.f32 %v1030_v1, %v2723_v31  ;;  %v1060_v31 = vmul.f32 %v2496_v33, %v1059_v35 }
 0x61c   :  { %v1051_v21 = vsel %vm154_vm0, %v3255_v57, 0.0  ;;  %v1061_v30 = vadd.f32 %v2496_v33, %v1060_v31 }
 0x61d   :  { %1052 = vadd.xlane.f32.xlu1 %v1051_v21 }
 0x61e   :  { %v3264_v47 = vsel %vm1062_vm12, %v2496_v33, %v1061_v30 }
 0x620   :  { %v1032_v20 = vpop.f32.mrf.mxu3 }
 0x621   :  { %v1033_v28 = vadd.f32 %v2399_v2, %v1032_v20  ;;  %v1175_v2 = vld [vmem:[%s3786_s14] sm:$0xff] }
 0x622   :  { %1213 = vmatpush.msra.mxu1 %v1175_v2 }
 0x623   :  { %v3260_v3 = vadd.f32 %v1033_v28, %v2730_v34 }
 0x625   :  { %v1054_v24 = vsel %vm154_vm0, %v3260_v3, 0.0 }
 0x626   :  { %1055 = vadd.xlane.f32.xlu0 %v1054_v24 }
 0x677   :  { %v1044_v36 = vpop.xlane.xlu1 %1043 }
 0x678   :  { %v1064_v48 = vmul.f32 %v3264_v47, %v1044_v36  ;;  %v3325_v36 = vld [vmem:[%s3784_s13] ss:$0 sm:$0xff] }
 0x67a   :  { %v3268_v34 = vsub.f32 %v3240_v4, %v1064_v48 }
 0x67c   :  { %v1074_v43 = vmul.f32 %v3268_v34, %v3268_v34 }
 0x67e   :  { %v1079_v51 = vsel %vm154_vm0, %v1074_v43, 0.0 }
 0x67f   :  { %v1047_v50 = vpop.xlane.xlu0 %1046  ;;  %1080 = vadd.xlane.f32.xlu2 %v1079_v51 }
 0x680   :  { %v1065_v46 = vmul.f32 %v3264_v47, %v1047_v50 }
 0x682   :  { %v3275_v59 = vsub.f32 %v3245_v58, %v1065_v46 }
 0x684   :  { %v1075_v45 = vmul.f32 %v3275_v59, %v3275_v59 }
 0x686   :  { %v1082_v6 = vsel %vm154_vm0, %v1075_v45, 0.0 }
 0x687   :  { %1083 = vadd.xlane.f32.xlu1 %v1082_v6 }
 0x688   :  { %v1050_v22 = vpop.xlane.xlu2 %1049 }
 0x689   :  { %v1066_v10 = vmul.f32 %v3264_v47, %v1050_v22 }
 0x68b   :  { %v3282_v15 = vsub.f32 %v3250_v17, %v1066_v10 }
 0x68d   :  { %v1076_v9 = vmul.f32 %v3282_v15, %v3282_v15 }
 0x68f   :  { %v1085_v62 = vsel %vm154_vm0, %v1076_v9, 0.0 }
 0x690   :  { %v1053_v54 = vpop.xlane.xlu1 %1052  ;;  %1086 = vadd.xlane.f32.xlu0 %v1085_v62 }
 0x691   :  { %v1067_v19 = vmul.f32 %v3264_v47, %v1053_v54 }
 0x693   :  { %v3289_v32 = vsub.f32 %v3255_v57, %v1067_v19 }
 0x695   :  { %v1077_v18 = vmul.f32 %v3289_v32, %v3289_v32 }
 0x697   :  { %v1088_v44 = vsel %vm154_vm0, %v1077_v18, 0.0 }
 0x698   :  { %1089 = vadd.xlane.f32.xlu2 %v1088_v44 }
 0x699   :  { %v1056_v26 = vpop.xlane.xlu0 %1055 }
 0x69a   :  { %v1068_v61 = vmul.f32 %v3264_v47, %v1056_v26 }
 0x69c   :  { %v3296_v53 = vsub.f32 %v3260_v3, %v1068_v61 }
 0x69e   :  { %v1078_v7 = vmul.f32 %v3296_v53, %v3296_v53 }
 0x6a0   :  { %v1091_v13 = vsel %vm154_vm0, %v1078_v7, 0.0 }
 0x6a1   :  { %1092 = vadd.xlane.f32.xlu1 %v1091_v13 }
 0x6f2   :  { %v1081_v11 = vpop.xlane.xlu2 %1080 }
 0x6f3   :  { %v1094_v56 = vmul.f32 %v1081_v11, %v3264_v47 }
 0x6f5   :  { %v1099_v12 = vadd.f32 1e-05, %v1094_v56 }
 0x6f7   :  { %2497 = vrsqrt.f32 %v1099_v12  ;;  %vm1110_vm14 = vweird.f32 %v1099_v12 }
 0x6fa   :  { %v1084_v37 = vpop.xlane.xlu1 %1083 }
 0x6fb   :  { %v1095_v60 = vmul.f32 %v1084_v37, %v3264_v47 }
 0x6fd   :  { %v2498_v27 = vpop.eup %2497  ;;  %v1100_v29 = vadd.f32 1e-05, %v1095_v60 }
 0x6fe   :  { %v1105_v63 = vmul.f32 %v2498_v27, %v1099_v12  ;;  %vm1111_vm13 = vweird.f32 %v2498_v27 }
 0x6ff   :  { %2499 = vrsqrt.f32 %v1100_v29  ;;  %vm1112_vm15 = vmor %vm1110_vm14, %vm1111_vm13  ;;  %vm1120_vm2 = vweird.f32 %v1100_v29  ;;  %vm1272_vm14 = vcmask 523264  }
 0x700   :  { %v1106_v14 = vmul.f32 %v2498_v27, %v1105_v63 }
 0x702   :  { %v1107_v23 = vmul.f32 0.5, %v1106_v14 }
 0x703   :  { %v1087_v1 = vpop.xlane.xlu0 %1086 }
 0x704   :  { %v1108_v21 = vsub.f32 1.5, %v1107_v23  ;;  %v1096_v20 = vmul.f32 %v1087_v1, %v3264_v47 }
 0x705   :  { %v2500_v28 = vpop.eup %2499 }
 0x706   :  { %v1109_v24 = vmul.f32 %v2498_v27, %v1108_v21  ;;  %v1115_v16 = vmul.f32 %v2500_v28, %v1100_v29  ;;  %v1101_v33 = vadd.f32 1e-05, %v1096_v20  ;;  %vm1121_vm1 = vweird.f32 %v2500_v28 }
 0x707   :  { %vm1122_vm3 = vmor %vm1120_vm2, %vm1121_vm1 }
 0x708   :  { %v1113_v35 = vsel %vm1112_vm15, %v2498_v27, %v1109_v24  ;;  %v1116_v31 = vmul.f32 %v2500_v28, %v1115_v16  ;;  %2501 = vrsqrt.f32 %v1101_v33  ;;  %vm1130_vm5 = vweird.f32 %v1101_v33 }
 0x709   :  { %v1154_v30 = vmul.f32 %v1113_v35, %v3268_v34 }
 0x70a   :  { %v1117_v48 = vmul.f32 0.5, %v1116_v31 }
 0x70b   :  { %v1162_v43 = vmul.f32 %v3319_v0, %v1154_v30  ;;  %v1090_v51 = vpop.xlane.xlu2 %1089 }
 0x70c   :  { %v1118_v50 = vsub.f32 1.5, %v1117_v48  ;;  %v1097_v46 = vmul.f32 %v1090_v51, %v3264_v47 }
 0x70d   :  { %v1170_v45 = vadd.f32 %v3325_v36, %v1162_v43 }
 0x70e   :  { %v2502_v6 = vpop.eup %2501  ;;  %v1119_v22 = vmul.f32 %v2500_v28, %v1118_v50  ;;  %v1102_v10 = vadd.f32 1e-05, %v1097_v46 }
 0x70f   :  { %v1125_v34 = vmul.f32 %v2502_v6, %v1101_v33  ;;  %2208 = vmatmul.msk.f32.vlgmr.msra.gmra.mxu1 %vm154_vm0, %v1170_v45  ;;  %vm1131_vm4 = vweird.f32 %v2502_v6 }
 0x710   :  { %v1123_v9 = vsel %vm1122_vm3, %v2500_v28, %v1119_v22  ;;  %2503 = vrsqrt.f32 %v1102_v10  ;;  %vm1132_vm6 = vmor %vm1130_vm5, %vm1131_vm4  ;;  %vm1140_vm8 = vweird.f32 %v1102_v10 }
 0x711   :  { %v1126_v62 = vmul.f32 %v2502_v6, %v1125_v34  ;;  %v1155_v54 = vmul.f32 %v1123_v9, %v3275_v59 }
 0x713   :  { %v1127_v19 = vmul.f32 0.5, %v1126_v62  ;;  %v1163_v44 = vmul.f32 %v3319_v0, %v1155_v54  ;;  %v1267_v62 = vld [vmem:[%s3788_s16 + $0x38] sm:$0xff]  ;;  %v1266_v54 = vld [vmem:[%s3788_s16 + $0x30] sm:$0xff] }
 0x714   :  { %v1093_v18 = vpop.xlane.xlu1 %1092  ;;  %1296 = vmatpush.msra.mxu2 %v1267_v62 }
 0x715   :  { %v1098_v26 = vmul.f32 %v1093_v18, %v3264_v47  ;;  %v1128_v61 = vsub.f32 1.5, %v1127_v19  ;;  %v1171_v7 = vadd.f32 %v3325_v36, %v1163_v44  ;;  %v1265_v19 = vld [vmem:[%s3788_s16 + $0x28] sm:$0xff]  ;;  %v1264_v18 = vld [vmem:[%s3788_s16 + $0x20] sm:$0xff]  ;;  %v1263_v44 = vld [vmem:[%s3788_s16 + $0x18] sm:$0xff] }
 0x716   :  { %v2504_v13 = vpop.eup %2503  ;;  %1297 = vmatpush.msra.mxu2 %v1266_v54 }
 0x717   :  { %v1103_v25 = vadd.f32 1e-05, %v1098_v26  ;;  %v1129_v49 = vmul.f32 %v2502_v6, %v1128_v61  ;;  %v1135_v55 = vmul.f32 %v2504_v13, %v1102_v10  ;;  %2209 = vmatmul.msk.f32.gmra.mxu1 %vm154_vm0, %v1171_v7  ;;  %vm1141_vm7 = vweird.f32 %v2504_v13  ;;  %v1262_v26 = vld [vmem:[%s3788_s16 + $0x10] sm:$0xff]  ;;  %v1261_v61 = vld [vmem:[%s3788_s16 + $0x8] sm:$0xff]  ;;  %v1260_v7 = vld [vmem:[%s3788_s16] sm:$0xff] }
 0x718   :  { %vm1142_vm9 = vmor %vm1140_vm8, %vm1141_vm7  ;;  %1298 = vmatpush.msra.mxu2 %v1265_v19 }
 0x719   :  { %2505 = vrsqrt.f32 %v1103_v25  ;;  %v1133_v59 = vsel %vm1132_vm6, %v2502_v6, %v1129_v49  ;;  %v1136_v2 = vmul.f32 %v2504_v13, %v1135_v55  ;;  %vm1150_vm12 = vweird.f32 %v1103_v25 }
 0x71a   :  { %v1156_v11 = vmul.f32 %v1133_v59, %v3282_v15  ;;  %1299 = vmatpush.msra.mxu2 %v1264_v18 }
 0x71b   :  { %v1137_v56 = vmul.f32 0.5, %v1136_v2 }
 0x71c   :  { %v1164_v12 = vmul.f32 %v3319_v0, %v1156_v11  ;;  %1300 = vmatpush.msra.mxu2 %v1263_v44 }
 0x71d   :  { %v1138_v37 = vsub.f32 1.5, %v1137_v56 }
 0x71e   :  { %v1172_v27 = vadd.f32 %v3325_v36, %v1164_v12  ;;  %1301 = vmatpush.msra.mxu2 %v1262_v26 }
 0x71f   :  { %v2506_v60 = vpop.eup %2505  ;;  %v1139_v29 = vmul.f32 %v2504_v13, %v1138_v37 }
 0x720   :  { %v1145_v63 = vmul.f32 %v2506_v60, %v1103_v25  ;;  %2210 = vmatmul.msk.f32.gmra.mxu1 %vm154_vm0, %v1172_v27  ;;  %vm1151_vm10 = vweird.f32 %v2506_v60  ;;  %1302 = vmatpush.msra.mxu2 %v1261_v61 }
 0x721   :  { %v1143_v14 = vsel %vm1142_vm9, %v2504_v13, %v1139_v29  ;;  %vm1152_vm13 = vmor %vm1150_vm12, %vm1151_vm10 }
 0x722   :  { %v1146_v23 = vmul.f32 %v2506_v60, %v1145_v63  ;;  %v1157_v1 = vmul.f32 %v1143_v14, %v3289_v32  ;;  %v2402_v32 = vld [vmem:[%s3785_s15] ss:$0 sm:$0xff]  ;;  %1303 = vmatpush.msra.mxu2 %v1260_v7 }
 0x724   :  { %v1147_v21 = vmul.f32 0.5, %v1146_v23  ;;  %v1165_v15 = vmul.f32 %v3319_v0, %v1157_v1 }
 0x726   :  { %v1148_v20 = vsub.f32 1.5, %v1147_v21  ;;  %v1173_v28 = vadd.f32 %v3325_v36, %v1165_v15 }
 0x728   :  { %v1149_v24 = vmul.f32 %v2506_v60, %v1148_v20  ;;  %2211 = vmatmul.msk.f32.gmra.mxu1 %vm154_vm0, %v1173_v28 }
 0x72a   :  { %v1153_v16 = vsel %vm1152_vm13, %v2506_v60, %v1149_v24  ;;  %v2403_v60 = vld [vmem:[%s3787_s17] ss:$0 sm:$0xff] }
 0x72b   :  { %v1158_v33 = vmul.f32 %v1153_v16, %v3296_v53 }
 0x72d   :  { %v1166_v35 = vmul.f32 %v3319_v0, %v1158_v33 }
 0x72f   :  { %v1174_v31 = vadd.f32 %v3325_v36, %v1166_v35 }
 0x731   :  { %2212 = vmatmul.msk.f32.gmra.mxu1 %vm154_vm0, %v1174_v31 }
 0x78c   :  { %v1215_v30 = vpop.f32.mrf.mxu1 }
 0x78d   :  { %v1216_v48 = vadd.f32 %v2402_v32, %v1215_v30 }
 0x78f   :  { %v1230_v43 = vmax.f32 %v1216_v48, 0.0 }
 0x791   :  { %1240 = vrot.lane.b32.xlu0 %v1230_v43, %s2540_s2 }
 0x794   :  { %v1218_v51 = vpop.f32.mrf.mxu1 }
 0x795   :  { %v1219_v50 = vadd.f32 %v2402_v32, %v1218_v51 }
 0x797   :  { %v1231_v46 = vmax.f32 %v1219_v50, 0.0 }
 0x799   :  { %1242 = vrot.lane.b32.xlu2 %v1231_v46, %s2540_s2 }
 0x79d   :  { %v1221_v53 = vpop.f32.mrf.mxu1 }
 0x79e   :  { %v1222_v0 = vadd.f32 %v2402_v32, %v1221_v53 }
 0x7a0   :  { %v1232_v45 = vmax.f32 %v1222_v0, 0.0 }
 0x7a2   :  { %1244 = vrot.lane.b32.xlu1 %v1232_v45, %s2540_s2 }
 0x7a5   :  { %v1224_v36 = vpop.f32.mrf.mxu1 }
 0x7a6   :  { %v1225_v6 = vadd.f32 %v2402_v32, %v1224_v36 }
 0x7a8   :  { %v1233_v22 = vmax.f32 %v1225_v6, 0.0 }
 0x7aa   :  { %1246 = vrot.lane.b32.xlu0 %v1233_v22, %s2540_s2 }
 0x7ae   :  { %v1227_v10 = vpop.f32.mrf.mxu1 }
 0x7af   :  { %v1228_v34 = vadd.f32 %v2402_v32, %v1227_v10 }
 0x7b1   :  { %v1234_v9 = vmax.f32 %v1228_v34, 0.0 }
 0x7b3   :  { %1248 = vrot.lane.b32.xlu2 %v1234_v9, %s2540_s2 }
 0x7f3   :  { %v1243_v49 = vpop.permute.xlu2 %1242 }
 0x7f4   :  { %v1256_v55 = vmul.f32 %v1243_v49, %v1219_v50  ;;  %v2222_v49 = vld [vmem:[%s3813_s24 + $0x30] sm:$0xff] }
 0x803   :  { %v1241_v13 = vpop.permute.xlu0 %1240 }
 0x804   :  { %v1255_v25 = vmul.f32 %v1241_v13, %v1216_v48 }
 0x806   :  { %2213 = vmatmul.msk.f32.vlgmr.msra.gmra.mxu2 %vm1272_vm14, %v1255_v25  ;;  %v2223_v25 = vld [vmem:[%s3813_s24 + $0x38] sm:$0xff] }
 0x807   :  { %1492 = vmatpush.msrb.mxu0 %v2223_v25 }
 0x809   :  { %1493 = vmatpush.msrb.mxu0 %v2222_v49 }
 0x80d   :  { %v1249_v12 = vpop.permute.xlu2 %1248 }
 0x80e   :  { %2214 = vmatmul.msk.f32.gmra.mxu2 %vm1272_vm14, %v1256_v55  ;;  %v1259_v37 = vmul.f32 %v1249_v12, %v1228_v34  ;;  %v2221_v55 = vld [vmem:[%s3813_s24 + $0x28] sm:$0xff] }
 0x80f   :  { %1494 = vmatpush.msrb.mxu0 %v2221_v55 }
 0x814   :  { %v1245_v59 = vpop.permute.xlu1 %1244 }
 0x815   :  { %v1257_v2 = vmul.f32 %v1245_v59, %v1222_v0  ;;  %v2220_v59 = vld [vmem:[%s3813_s24 + $0x20] sm:$0xff] }
 0x816   :  { %1495 = vmatpush.msrb.mxu0 %v2220_v59 }
 0x817   :  { %2215 = vmatmul.msk.f32.gmra.mxu2 %vm1272_vm14, %v1257_v2 }
 0x81c   :  { %v1247_v11 = vpop.permute.xlu0 %1246 }
 0x81d   :  { %v1258_v56 = vmul.f32 %v1247_v11, %v1225_v6 }
 0x81f   :  { %2216 = vmatmul.msk.f32.gmra.mxu2 %vm1272_vm14, %v1258_v56 }
 0x827   :  { %2217 = vmatmul.msk.f32.gmra.mxu2 %vm1272_vm14, %v1259_v37 }
 0x889   :  { %v1305_v27 = vpop.f32.mrf.mxu2 }
 0x88a   :  { %v1306_v29 = vadd.f32 %v2403_v60, %v1305_v27 }
 0x88c   :  { %v3389_v63 = vadd.f32 %v1306_v29, %v3240_v4 }
 0x88e   :  { %v1329_v14 = vsel %vm154_vm0, %v3389_v63, 0.0 }
 0x88f   :  { %1330 = vadd.xlane.f32.xlu0 %v1329_v14 }
 0x891   :  { %v1308_v23 = vpop.f32.mrf.mxu2 }
 0x892   :  { %v1309_v1 = vadd.f32 %v2403_v60, %v1308_v23 }
 0x894   :  { %v3394_v21 = vadd.f32 %v1309_v1, %v3245_v58 }
 0x896   :  { %v1332_v15 = vsel %vm154_vm0, %v3394_v21, 0.0 }
 0x897   :  { %1333 = vadd.xlane.f32.xlu1 %v1332_v15 }
 0x89a   :  { %v1311_v20 = vpop.f32.mrf.mxu2 }
 0x89b   :  { %v1312_v28 = vadd.f32 %v2403_v60, %v1311_v20 }
 0x89d   :  { %v3399_v24 = vadd.f32 %v1312_v28, %v3250_v17 }
 0x89f   :  { %v1335_v4 = vsel %vm154_vm0, %v3399_v24, 0.0 }
 0x8a0   :  { %1336 = vadd.xlane.f32.xlu2 %v1335_v4 }
 0x8a2   :  { %v1314_v16 = vpop.f32.mrf.mxu2 }
 0x8a3   :  { %v1315_v33 = vadd.f32 %v2403_v60, %v1314_v16 }
 0x8a5   :  { %v3404_v35 = vadd.f32 %v1315_v33, %v3255_v57 }
 0x8a7   :  { %v1338_v58 = vsel %vm154_vm0, %v3404_v35, 0.0 }
 0x8a8   :  { %1339 = vadd.xlane.f32.xlu0 %v1338_v58  ;;  %v3466_v58 = vld [vmem:[%s3789_s6 + $0x1] ss:$0 sm:$0xff] }
 0x8aa   :  { %v1317_v31 = vpop.f32.mrf.mxu2 }
 0x8ab   :  { %v1318_v32 = vadd.f32 %v2403_v60, %v1317_v31 }
 0x8ad   :  { %v3409_v30 = vadd.f32 %v1318_v32, %v3260_v3 }
 0x8af   :  { %v1341_v17 = vsel %vm154_vm0, %v3409_v30, 0.0 }
 0x8b0   :  { %1342 = vadd.xlane.f32.xlu2 %v1341_v17 }
 0x902   :  { %v1331_v48 = vpop.xlane.xlu0 %1330 }
 0x903   :  { %v1344_v43 = vmul.f32 %v1331_v48, %v3264_v47  ;;  %v3472_v48 = vld [vmem:[%s3790_s7 + $0x1] ss:$0 sm:$0xff] }
 0x905   :  { %v3415_v51 = vsub.f32 %v3389_v63, %v1344_v43 }
 0x907   :  { %v1354_v57 = vmul.f32 %v3415_v51, %v3415_v51 }
 0x909   :  { %v1359_v50 = vsel %vm154_vm0, %v1354_v57, 0.0 }
 0x90a   :  { %v1334_v46 = vpop.xlane.xlu1 %1333  ;;  %1360 = vadd.xlane.f32.xlu1 %v1359_v50 }
 0x90b   :  { %v1345_v3 = vmul.f32 %v1334_v46, %v3264_v47 }
 0x90d   :  { %v3422_v53 = vsub.f32 %v3394_v21, %v1345_v3 }
 0x90f   :  { %v1355_v0 = vmul.f32 %v3422_v53, %v3422_v53 }
 0x911   :  { %v1362_v45 = vsel %vm154_vm0, %v1355_v0, 0.0 }
 0x912   :  { %1363 = vadd.xlane.f32.xlu0 %v1362_v45 }
 0x913   :  { %v1337_v36 = vpop.xlane.xlu2 %1336 }
 0x914   :  { %v1346_v6 = vmul.f32 %v1337_v36, %v3264_v47 }
 0x916   :  { %v3429_v22 = vsub.f32 %v3399_v24, %v1346_v6 }
 0x918   :  { %v1356_v10 = vmul.f32 %v3429_v22, %v3429_v22 }
 0x91a   :  { %v1365_v34 = vsel %vm154_vm0, %v1356_v10, 0.0 }
 0x91b   :  { %1366 = vadd.xlane.f32.xlu2 %v1365_v34  ;;  %v1340_v9 = vpop.xlane.xlu0 %1339 }
 0x91c   :  { %v1347_v62 = vmul.f32 %v1340_v9, %v3264_v47 }
 0x91e   :  { %v3436_v54 = vsub.f32 %v3404_v35, %v1347_v62 }
 0x920   :  { %v1357_v19 = vmul.f32 %v3436_v54, %v3436_v54 }
 0x922   :  { %v1368_v18 = vsel %vm154_vm0, %v1357_v19, 0.0 }
 0x923   :  { %v1343_v44 = vpop.xlane.xlu2 %1342  ;;  %1369 = vadd.xlane.f32.xlu1 %v1368_v18 }
 0x924   :  { %v1348_v26 = vmul.f32 %v1343_v44, %v3264_v47 }
 0x926   :  { %v3443_v61 = vsub.f32 %v3409_v30, %v1348_v26 }
 0x928   :  { %v1358_v7 = vmul.f32 %v3443_v61, %v3443_v61 }
 0x92a   :  { %v1371_v13 = vsel %vm154_vm0, %v1358_v7, 0.0 }
 0x92b   :  { %1372 = vadd.xlane.f32.xlu0 %v1371_v13 }
 0x97d   :  { %v1361_v2 = vpop.xlane.xlu1 %1360 }
 0x97e   :  { %v1374_v11 = vmul.f32 %v1361_v2, %v3264_v47 }
 0x980   :  { %v1379_v56 = vadd.f32 1e-05, %v1374_v11 }
 0x982   :  { %2507 = vrsqrt.f32 %v1379_v56  ;;  %vm1390_vm1 = vweird.f32 %v1379_v56 }
 0x985   :  { %v1364_v12 = vpop.xlane.xlu0 %1363 }
 0x986   :  { %v1375_v37 = vmul.f32 %v1364_v12, %v3264_v47 }
 0x988   :  { %v2508_v60 = vpop.eup %2507  ;;  %v1380_v27 = vadd.f32 1e-05, %v1375_v37 }
 0x989   :  { %v1385_v29 = vmul.f32 %v2508_v60, %v1379_v56  ;;  %vm1391_vm15 = vweird.f32 %v2508_v60 }
 0x98a   :  { %2509 = vrsqrt.f32 %v1380_v27  ;;  %vm1392_vm2 = vmor %vm1390_vm1, %vm1391_vm15  ;;  %vm1400_vm4 = vweird.f32 %v1380_v27 }
 0x98b   :  { %v1386_v14 = vmul.f32 %v2508_v60, %v1385_v29 }
 0x98d   :  { %v1387_v23 = vmul.f32 0.5, %v1386_v14 }
 0x98e   :  { %v1367_v1 = vpop.xlane.xlu2 %1366 }
 0x98f   :  { %v1388_v15 = vsub.f32 1.5, %v1387_v23  ;;  %v1376_v20 = vmul.f32 %v1367_v1, %v3264_v47 }
 0x990   :  { %v2510_v28 = vpop.eup %2509 }
 0x991   :  { %v1389_v4 = vmul.f32 %v2508_v60, %v1388_v15  ;;  %v1395_v16 = vmul.f32 %v2510_v28, %v1380_v27  ;;  %v1381_v33 = vadd.f32 1e-05, %v1376_v20  ;;  %vm1401_vm3 = vweird.f32 %v2510_v28 }
 0x992   :  { %vm1402_vm5 = vmor %vm1400_vm4, %vm1401_vm3 }
 0x993   :  { %v1393_v31 = vsel %vm1392_vm2, %v2508_v60, %v1389_v4  ;;  %v1396_v32 = vmul.f32 %v2510_v28, %v1395_v16  ;;  %2511 = vrsqrt.f32 %v1381_v33  ;;  %vm1410_vm7 = vweird.f32 %v1381_v33 }
 0x994   :  { %v1434_v17 = vmul.f32 %v1393_v31, %v3415_v51 }
 0x995   :  { %v1397_v43 = vmul.f32 0.5, %v1396_v32 }
 0x996   :  { %v1442_v57 = vmul.f32 %v3466_v58, %v1434_v17  ;;  %v1370_v50 = vpop.xlane.xlu1 %1369  ;;  %v2406_v17 = vld [vmem:[%s3816_s28 + $0x1] ss:$0 sm:$0xff] }
 0x997   :  { %v1398_v46 = vsub.f32 1.5, %v1397_v43  ;;  %v1377_v3 = vmul.f32 %v1370_v50, %v3264_v47 }
 0x998   :  { %v1450_v0 = vadd.f32 %v3472_v48, %v1442_v57 }
 0x999   :  { %v2512_v45 = vpop.eup %2511  ;;  %v1399_v36 = vmul.f32 %v2510_v28, %v1398_v46  ;;  %v1382_v6 = vadd.f32 1e-05, %v1377_v3 }
 0x99a   :  { %v1405_v51 = vmul.f32 %v2512_v45, %v1381_v33  ;;  %2225 = vmatmul.msk.f32.vlgmr.msrb.gmra.mxu0 %vm154_vm0, %v1450_v0  ;;  %vm1411_vm6 = vweird.f32 %v2512_v45 }
 0x99b   :  { %v1403_v10 = vsel %vm1402_vm5, %v2510_v28, %v1399_v36  ;;  %2513 = vrsqrt.f32 %v1382_v6  ;;  %vm1412_vm8 = vmor %vm1410_vm7, %vm1411_vm6  ;;  %vm1420_vm10 = vweird.f32 %v1382_v6  ;;  %vm2128_vm6 = vcmask 7168  }
 0x99c   :  { %v1406_v34 = vmul.f32 %v2512_v45, %v1405_v51  ;;  %v1435_v9 = vmul.f32 %v1403_v10, %v3422_v53 }
 0x99e   :  { %v1407_v62 = vmul.f32 0.5, %v1406_v34  ;;  %v1373_v19 = vpop.xlane.xlu0 %1372  ;;  %v1443_v18 = vmul.f32 %v3466_v58, %v1435_v9 }
 0x99f   :  { %v1378_v44 = vmul.f32 %v1373_v19, %v3264_v47 }
 0x9a0   :  { %v1408_v26 = vsub.f32 1.5, %v1407_v62  ;;  %v1451_v7 = vadd.f32 %v3472_v48, %v1443_v18 }
 0x9a1   :  { %v2514_v13 = vpop.eup %2513  ;;  %v1383_v25 = vadd.f32 1e-05, %v1378_v44 }
 0x9a2   :  { %v1409_v49 = vmul.f32 %v2512_v45, %v1408_v26  ;;  %v1415_v55 = vmul.f32 %v2514_v13, %v1382_v6  ;;  %2226 = vmatmul.msk.f32.gmra.mxu0 %vm154_vm0, %v1451_v7  ;;  %vm1421_vm9 = vweird.f32 %v2514_v13 }
 0x9a3   :  { %2515 = vrsqrt.f32 %v1383_v25  ;;  %vm1422_vm12 = vmor %vm1420_vm10, %vm1421_vm9  ;;  %vm1430_vm15 = vweird.f32 %v1383_v25 }
 0x9a4   :  { %v1413_v53 = vsel %vm1412_vm8, %v2512_v45, %v1409_v49  ;;  %v1416_v59 = vmul.f32 %v2514_v13, %v1415_v55 }
 0x9a5   :  { %v1436_v2 = vmul.f32 %v1413_v53, %v3429_v22 }
 0x9a6   :  { %v1417_v11 = vmul.f32 0.5, %v1416_v59 }
 0x9a7   :  { %v1444_v56 = vmul.f32 %v3466_v58, %v1436_v2 }
 0x9a8   :  { %v1418_v12 = vsub.f32 1.5, %v1417_v11 }
 0x9a9   :  { %v2516_v37 = vpop.eup %2515  ;;  %v1452_v60 = vadd.f32 %v3472_v48, %v1444_v56 }
 0x9aa   :  { %v1419_v27 = vmul.f32 %v2514_v13, %v1418_v12  ;;  %v1425_v29 = vmul.f32 %v2516_v37, %v1383_v25  ;;  %vm1431_vm13 = vweird.f32 %v2516_v37 }
 0x9ab   :  { %2227 = vmatmul.msk.f32.gmra.mxu0 %vm154_vm0, %v1452_v60  ;;  %vm1432_vm1 = vmor %vm1430_vm15, %vm1431_vm13 }
 0x9ac   :  { %v1423_v14 = vsel %vm1422_vm12, %v2514_v13, %v1419_v27  ;;  %v1426_v23 = vmul.f32 %v2516_v37, %v1425_v29 }
 0x9ad   :  { %v1437_v1 = vmul.f32 %v1423_v14, %v3436_v54 }
 0x9ae   :  { %v1427_v15 = vmul.f32 0.5, %v1426_v23 }
 0x9af   :  { %v1445_v22 = vmul.f32 %v3466_v58, %v1437_v1 }
 0x9b0   :  { %v1428_v20 = vsub.f32 1.5, %v1427_v15 }
 0x9b1   :  { %v1453_v28 = vadd.f32 %v3472_v48, %v1445_v22  ;;  %v3574_v22 = vld [vmem:[%s3791_s5] sm:$0xff] }
 0x9b2   :  { %v1429_v4 = vmul.f32 %v2516_v37, %v1428_v20 }
 0x9b3   :  { %2228 = vmatmul.msk.f32.gmra.mxu0 %vm154_vm0, %v1453_v28 }
 0x9b4   :  { %v1433_v16 = vsel %vm1432_vm1, %v2516_v37, %v1429_v4 }
 0x9b5   :  { %v1438_v33 = vmul.f32 %v1433_v16, %v3443_v61 }
 0x9b7   :  { %v1446_v31 = vmul.f32 %v3466_v58, %v1438_v33 }
 0x9b9   :  { %v1454_v32 = vadd.f32 %v3472_v48, %v1446_v31 }
 0x9bb   :  { %2229 = vmatmul.msk.f32.gmra.mxu0 %vm154_vm0, %v1454_v32 }
 0xa17   :  { %v1497_v54 = vpop.f32.mrf.mxu0 }
 0xa18   :  { %v1498_v43 = vadd.f32 %v2406_v17, %v1497_v54 }
 0xa1a   :  { %v3499_v46 = vmul.f32 %v2999_v8, %v1498_v43  ;;  %v3505_v61 = vmul.f32 %v3121_v5, %v1498_v43  ;;  %v3559_v37 = vmul.f32 %v3075_v41, %v1498_v43  ;;  %v1641_v20 = vmul.f32 %v1498_v43, %v2902_v42 }
 0xa1f   :  { %v1500_v57 = vpop.f32.mrf.mxu0 }
 0xa20   :  { %v1501_v50 = vadd.f32 %v2406_v17, %v1500_v57 }
 0xa22   :  { %v3502_v3 = vmul.f32 %v3075_v41, %v1501_v50  ;;  %v3508_v58 = vmul.f32 %v3121_v5, %v1501_v50  ;;  %v3516_v6 = vmul.f32 %v2999_v8, %v1501_v50  ;;  %v3522_v10 = vmul.f32 %v1501_v50, %v2902_v42 }
 0xa23   :  { %v1513_v15 = vmul.f32 0.35355338, %v1501_v50 }
 0xa24   :  { %v2378_v48 = vpack.i.bf16 %v3499_v46, %v3502_v3  ;;  %v2393_v0 = vpack.i.bf16 %v3505_v61, %v3508_v58 }
 0xa28   :  { %v1503_v45 = vpop.f32.mrf.mxu0 }
 0xa29   :  { %v1504_v36 = vadd.f32 %v2406_v17, %v1503_v45 }
 0xa2b   :  { %1551 = vrot.lane.b32.xlu0 %v1504_v36, %s2539_s30  ;;  %v3519_v51 = vmul.f32 %v3075_v41, %v1504_v36  ;;  %v3525_v34 = vmul.f32 %v1504_v36, %v2902_v42  ;;  %v3534_v44 = vmul.f32 %v2999_v8, %v1504_v36  ;;  %v3540_v7 = vmul.f32 %v3121_v5, %v1504_v36 }
 0xa2c   :  { %v1514_v1 = vmul.f32 0.35355338, %v1504_v36 }
 0xa2d   :  { %v2373_v9 = vpack.i.bf16 %v3516_v6, %v3519_v51  ;;  %v2353_v62 = vpack.i.bf16 %v3522_v10, %v3525_v34 }
 0xa30   :  { %v1506_v19 = vpop.f32.mrf.mxu0 }
 0xa31   :  { %v1507_v18 = vadd.f32 %v2406_v17, %v1506_v19 }
 0xa33   :  { %1553 = vrot.lane.b32.xlu1 %v1507_v18, %s2539_s30  ;;  %1547 = vrot.lane.b32.xlu0 %v1498_v43, %s2539_s30  ;;  %v3537_v26 = vmul.f32 %v3075_v41, %v1507_v18  ;;  %v3543_v13 = vmul.f32 %v3121_v5, %v1507_v18  ;;  %v1644_v59 = vmul.f32 %v1507_v18, %v2902_v42  ;;  %v1515_v29 = vmul.f32 0.35355338, %v1507_v18 }
 0xa34   :  { %v3553_v56 = vmul.f32 %v2999_v8, %v1507_v18  ;;  %v1540_v18 = vld [vmem:[%s3792_s4] sm:$0xff] }
 0xa35   :  { %v2368_v25 = vpack.i.bf16 %v3534_v44, %v3537_v26  ;;  %v2388_v49 = vpack.i.bf16 %v3540_v7, %v3543_v13 }
 0xa38   :  { %v1509_v55 = vpop.f32.mrf.mxu0 }
 0xa39   :  { %v1510_v53 = vadd.f32 %v2406_v17, %v1509_v55 }
 0xa3b   :  { %1555 = vrot.lane.b32.xlu2 %v1510_v53, %s2539_s30  ;;  %v1516_v2 = vmul.f32 0.35355338, %v1510_v53  ;;  %v1645_v11 = vmul.f32 %v1510_v53, %v2902_v42  ;;  %v3556_v12 = vmul.f32 %v3075_v41, %v1510_v53  ;;  %v3562_v60 = vmul.f32 %v3121_v5, %v1510_v53 }
 0xa3c   :  { %v1605_v41 = vmul.f32 %v2999_v8, %v1510_v53  ;;  %v1512_v5 = vmul.f32 0.35355338, %v1498_v43 }
 0xa3d   :  { %1531 = vmatpush.msrb.mxu3 %v1516_v2  ;;  %v2348_v27 = vpack.i.bf16 %v1644_v59, %v1645_v11  ;;  %v2363_v14 = vpack.i.bf16 %v3553_v56, %v3556_v12  ;;  %v2383_v23 = vpack.i.bf16 %v3562_v60, %v3559_v37 }
 0xa3e   :  { %v2358_v28 = vpack.i.bf16 %v1605_v41, %v1641_v20 }
 0xa3f   :  { %2349 = vrot.lane.b32.xlu0 %v2348_v27, %s2540_s2  ;;  %1532 = vmatpush.msrb.mxu3 %v1515_v29 }
 0xa41   :  { %1533 = vmatpush.msrb.mxu3 %v1514_v1 }
 0xa43   :  { %1549 = vrot.lane.b32.xlu2 %v1501_v50, %s2539_s30  ;;  %1534 = vmatpush.msrb.mxu3 %v1513_v15 }
 0xa45   :  { %1535 = vmatpush.msrb.mxu3 %v1512_v5 }
 0xa46   :  { %2230 = vmatmul.msk.f32.vlgmr.msrb.gmra.mxu3 %vm289_vm11, %v3574_v22 }
 0xa47   :  { %2359 = vrot.lane.b32.xlu0 %v2358_v28, %s2540_s2 }
 0xa95   :  { %v1556_v4 = vpop.permute.xlu2 %1555 }
 0xa96   :  { %2231 = vmatpush.xpose.msk.msrb.mxu1 %vm154_vm0, %v1556_v4  ;;  %2237 = vmatpush.xpose.msk.msrb.mxu2 %vm154_vm0, %v1556_v4 }
 0xa97   :  { %2252 = vmatpush.xpose.msk.msra.mxu0 %vm154_vm0, %v1556_v4 }
 0xa9d   :  { %v1552_v8 = vpop.permute.xlu0 %1551  ;;  %v1550_v33 = vpop.permute.xlu2 %1549 }
 0xaa5   :  { %v1554_v16 = vpop.permute.xlu1 %1553  ;;  %v1548_v42 = vpop.permute.xlu0 %1547 }
 0xaa6   :  { %2232 = vmatpush.xpose.msk.msrb.mxu1 %vm154_vm0, %v1554_v16  ;;  %2238 = vmatpush.xpose.msk.msrb.mxu2 %vm154_vm0, %v1554_v16 }
 0xaa7   :  { %2253 = vmatpush.xpose.msk.msra.mxu0 %vm154_vm0, %v1554_v16 }
 0xaaa   :  { %2233 = vmatpush.xpose.msk.msrb.mxu1 %vm154_vm0, %v1552_v8  ;;  %2239 = vmatpush.xpose.msk.msrb.mxu2 %vm154_vm0, %v1552_v8 }
 0xaab   :  { %2254 = vmatpush.xpose.msk.msra.mxu0 %vm154_vm0, %v1552_v8 }
 0xaae   :  { %2234 = vmatpush.xpose.msk.msrb.mxu1 %vm154_vm0, %v1550_v33  ;;  %2240 = vmatpush.xpose.msk.msrb.mxu2 %vm154_vm0, %v1550_v33 }
 0xaaf   :  { %2255 = vmatpush.xpose.msk.msra.mxu0 %vm154_vm0, %v1550_v33 }
 0xab1   :  { %v2350_v31 = vpop.permute.xlu0 %2349 }
 0xab2   :  { %v2351_v32 = vunpack.i.l.bf16 %v2350_v31  ;;  %2235 = vmatpush.xpose.msk.msrb.mxu1 %vm154_vm0, %v1548_v42  ;;  %2241 = vmatpush.xpose.msk.msrb.mxu2 %vm154_vm0, %v1548_v42  ;;  %v2352_v54 = vunpack.i.h.bf16 %v2350_v31 }
 0xab3   :  { %2256 = vmatpush.xpose.msk.msra.mxu0 %vm154_vm0, %v1548_v42 }
 0xab4   :  { %1680 = vmatpush.msra.mxu3 %v2351_v32 }
 0xab6   :  { %2245 = vmatpush.xpose.msk.msra.mxu2 %vm154_vm0, %v1556_v4  ;;  %1681 = vmatpush.msra.mxu3 %v2352_v54 }
 0xab9   :  { %v3597_v17 = vpop.permute.xlu0 %2359 }
 0xaba   :  { %2246 = vmatpush.xpose.msk.msra.mxu2 %vm154_vm0, %v1554_v16  ;;  %v2362_v43 = vunpack.i.h.bf16 %v3597_v17  ;;  %v2361_v28 = vunpack.i.l.bf16 %v3597_v17 }
 0xabc   :  { %1723 = vmatpush.msra.mxu1 %v2362_v43 }
 0xabe   :  { %2247 = vmatpush.xpose.msk.msra.mxu2 %vm154_vm0, %v1552_v8 }
 0xac2   :  { %2248 = vmatpush.xpose.msk.msra.mxu2 %vm154_vm0, %v1550_v33 }
 0xac6   :  { %2249 = vmatpush.xpose.msk.msra.mxu2 %vm154_vm0, %v1548_v42 }
 0xac9   :  { %v1537_v57 = vpop.f32.mrf.mxu3 }
 0xaca   :  { %v1541_v50 = vmul.f32 %v2734_v38, %v1537_v57  ;;  %v1606_v45 = vmul.f32 %v2761_v52, %v1537_v57  ;;  %v1816_v36 = vmul.f32 %v2736_v39, %v1537_v57  ;;  %v1732_v19 = vmul.f32 %v2738_v40, %v1537_v57 }
 0xacc   :  { %2236 = vmatmul.msk.f32.vlgmr.msrb.gmra.mxu1 %vm154_vm0, %v1541_v50  ;;  %2242 = vmatmul.msk.f32.vlgmr.msrb.gmra.mxu2 %vm154_vm0, %v1606_v45 }
 0xacd   :  { %2257 = vmatmul.msk.f32.vlgmr.msra.gmra.mxu0 %vm154_vm0, %v1816_v36 }
 0xad4   :  { %2250 = vmatmul.msk.f32.vlgmr.msra.gmra.mxu2 %vm154_vm0, %v1732_v19 }
 0xb49   :  { %v1587_v55 = vpop.f32.mrf.mxu1 }
 0xb4a   :  { %v1588_v38 = vadd.f32 %v1587_v55, %v1540_v18  ;;  %v1837_v2 = vpop.f32.mrf.mxu0 }
 0xb4b   :  { %v1838_v11 = vadd.f32 %v1837_v2, %v1540_v18 }
 0xb4c   :  { %v1590_v52 = vsel %vm289_vm11, %v1588_v38, -inf }
 0xb4d   :  { %1591 = vmax.xlane.f32.xlu2 %v1590_v52  ;;  %v1840_v1 = vsel %vm289_vm11, %v1838_v11, -inf  ;;  %v2261_v52 = vld [vmem:[%s3818_s23 + $0x30] sm:$0xff] }
 0xb4f   :  { %v1627_v39 = vpop.f32.mrf.mxu2 }
 0xb50   :  { %v1628_v53 = vadd.f32 %v1627_v39, %v1540_v18 }
 0xb52   :  { %v1630_v59 = vsel %vm289_vm11, %v1628_v53, -inf }
 0xb53   :  { %1631 = vmax.xlane.f32.xlu1 %v1630_v59  ;;  %v2259_v59 = vld [vmem:[%s3818_s23 + $0x20] sm:$0xff] }
 0xb57   :  { %v1753_v27 = vpop.f32.mrf.mxu2 }
 0xb58   :  { %v1754_v40 = vadd.f32 %v1753_v27, %v1540_v18 }
 0xb5a   :  { %v1756_v29 = vsel %vm289_vm11, %v1754_v40, -inf }
 0xb5b   :  { %1757 = vmax.xlane.f32.xlu0 %v1756_v29  ;;  %1841 = vmax.xlane.f32.xlu1 %v1840_v1 }
 0xb65   :  { %2364 = vrot.lane.b32.xlu2 %v2363_v14, %s2540_s2 }
 0xb6f   :  { %2374 = vrot.lane.b32.xlu0 %v2373_v9, %s2540_s2 }
 0xb74   :  { %2354 = vrot.lane.b32.xlu1 %v2353_v62, %s2540_s2 }
 0xb7c   :  { %2369 = vrot.lane.b32.xlu1 %v2368_v25, %s2540_s2 }
 0xb84   :  { %2379 = vrot.lane.b32.xlu1 %v2378_v48, %s2540_s2 }
 0xb8c   :  { %2384 = vrot.lane.b32.xlu1 %v2383_v23, %s2540_s2 }
 0xb94   :  { %2394 = vrot.lane.b32.xlu1 %v2393_v0, %s2540_s2 }
 0xbc0   :  { %v1592_v6 = vpop.xlane.xlu2 %1591 }
 0xbc1   :  { %v1593_v51 = vsub.f32 %v1588_v38, %v1592_v6  ;;  %v2262_v38 = vld [vmem:[%s3818_s23 + $0x38] sm:$0xff] }
 0xbc3   :  { %v1594_v10 = vmul.f32 1.442695, %v1593_v51 }
 0xbc5   :  { %2517 = vpow2.f32 %v1594_v10 }
 0xbc6   :  { %v1632_v34 = vpop.xlane.xlu1 %1631 }
 0xbc7   :  { %v1633_v9 = vsub.f32 %v1628_v53, %v1632_v34  ;;  %v2260_v53 = vld [vmem:[%s3818_s23 + $0x28] sm:$0xff] }
 0xbc8   :  { %v2365_v62 = vpop.permute.xlu2 %2364 }
 0xbc9   :  { %v1634_v44 = vmul.f32 1.442695, %v1633_v9  ;;  %v2367_v46 = vunpack.i.h.bf16 %v2365_v62  ;;  %v2366_v4 = vunpack.i.l.bf16 %v2365_v62 }
 0xbcb   :  { %v2518_v3 = vpop.eup %2517  ;;  %2519 = vpow2.f32 %v1634_v44  ;;  %1724 = vmatpush.msra.mxu1 %v2367_v46 }
 0xbcc   :  { %v1596_v48 = vsel %vm289_vm11, %v2518_v3, 0.0 }
 0xbcd   :  { %1597 = vadd.xlane.f32.xlu2 %v1596_v48 }
 0xbce   :  { %v1842_v26 = vpop.xlane.xlu1 %1841  ;;  %v1758_v25 = vpop.xlane.xlu0 %1757 }
 0xbcf   :  { %v1843_v56 = vsub.f32 %v1838_v11, %v1842_v26  ;;  %v1759_v61 = vsub.f32 %v1754_v40, %v1758_v25 }
 0xbd1   :  { %v2520_v58 = vpop.eup %2519  ;;  %v1844_v0 = vmul.f32 1.442695, %v1843_v56  ;;  %v1760_v12 = vmul.f32 1.442695, %v1759_v61 }
 0xbd2   :  { %v1636_v37 = vsel %vm289_vm11, %v2520_v58, 0.0 }
 0xbd3   :  { %2521 = vpow2.f32 %v1844_v0 }
 0xbd4   :  { %2523 = vpow2.f32 %v1760_v12  ;;  %v2271_v12 = vld [vmem:[%s3786_s14 + $0x38] sm:$0xff] }
 0xbd5   :  { %1637 = vadd.xlane.f32.xlu2 %v1636_v37  ;;  %v2270_v37 = vld [vmem:[%s3786_s14 + $0x30] sm:$0xff] }
 0xbd9   :  { %v3648_v60 = vpop.eup %2521 }
 0xbda   :  { %v2524_v14 = vpop.eup %2523  ;;  %v1846_v23 = vsel %vm289_vm11, %v3648_v60, 0.0 }
 0xbdb   :  { %1847 = vadd.xlane.f32.xlu0 %v1846_v23  ;;  %v1762_v15 = vsel %vm289_vm11, %v2524_v14, 0.0 }
 0xbdd   :  { %1763 = vadd.xlane.f32.xlu2 %v1762_v15 }
 0xbe1   :  { %v2375_v8 = vpop.permute.xlu0 %2374 }
 0xbe2   :  { %v2377_v31 = vunpack.i.h.bf16 %v2375_v8  ;;  %v2376_v32 = vunpack.i.l.bf16 %v2375_v8 }
 0xbe6   :  { %v2355_v41 = vpop.permute.xlu1 %2354 }
 0xbe7   :  { %v2356_v5 = vunpack.i.l.bf16 %v2355_v41  ;;  %v2357_v20 = vunpack.i.h.bf16 %v2355_v41 }
 0xbe9   :  { %1682 = vmatpush.msra.mxu3 %v2356_v5 }
 0xbeb   :  { %1683 = vmatpush.msra.mxu3 %v2357_v20 }
 0xbed   :  { %1684 = vmatpush.msra.mxu3 %v2361_v28 }
 0xbee   :  { %v2370_v16 = vpop.permute.xlu1 %2369 }
 0xbef   :  { %1806 = vmatpush.msrb.mxu3 %v2366_v4  ;;  %v2372_v42 = vunpack.i.h.bf16 %v2370_v16  ;;  %v2371_v33 = vunpack.i.l.bf16 %v2370_v16 }
 0xbf1   :  { %1725 = vmatpush.msra.mxu1 %v2372_v42  ;;  %1807 = vmatpush.msrb.mxu3 %v2371_v33  ;;  %v2408_v42 = vld [vmem:[%s3783_s12 + $0x1] ss:$0 sm:$0xff] }
 0xbf3   :  { %1726 = vmatpush.msra.mxu1 %v2377_v31  ;;  %1808 = vmatpush.msrb.mxu3 %v2376_v32  ;;  %v2409_v32 = vld [vmem:[%s3784_s13 + $0x1] ss:$0 sm:$0xff] }
 0xbf5   :  { %2389 = vrot.lane.b32.xlu2 %v2388_v49, %s2540_s2 }
 0xbf6   :  { %v2380_v54 = vpop.permute.xlu1 %2379 }
 0xbf7   :  { %v2382_v17 = vunpack.i.h.bf16 %v2380_v54  ;;  %v2381_v43 = vunpack.i.l.bf16 %v2380_v54 }
 0xbf9   :  { %1727 = vmatpush.msra.mxu1 %v2382_v17  ;;  %1809 = vmatpush.msrb.mxu3 %v2381_v43  ;;  %v2281_v43 = vld [vmem:[%s3788_s16 + $0x78] sm:$0xff] }
 0xbfa   :  { %2051 = vmatpush.msrb.mxu2 %v2281_v43 }
 0xbfe   :  { %v2385_v57 = vpop.permute.xlu1 %2384 }
 0xbff   :  { %v2387_v50 = vunpack.i.h.bf16 %v2385_v57  ;;  %v2386_v45 = vunpack.i.l.bf16 %v2385_v57  ;;  %v2280_v57 = vld [vmem:[%s3788_s16 + $0x70] sm:$0xff] }
 0xc00   :  { %2052 = vmatpush.msrb.mxu2 %v2280_v57 }
 0xc01   :  { %1810 = vmatpush.msrb.mxu3 %v2386_v45  ;;  %1890 = vmatpush.msrb.mxu1 %v2387_v50  ;;  %v2279_v50 = vld [vmem:[%s3788_s16 + $0x68] sm:$0xff]  ;;  %v2278_v45 = vld [vmem:[%s3788_s16 + $0x60] sm:$0xff] }
 0xc02   :  { %2053 = vmatpush.msrb.mxu2 %v2279_v50 }
 0xc04   :  { %2054 = vmatpush.msrb.mxu2 %v2278_v45 }
 0xc06   :  { %v2395_v29 = vpop.permute.xlu1 %2394 }
 0xc07   :  { %v2396_v51 = vunpack.i.l.bf16 %v2395_v29  ;;  %v2397_v10 = vunpack.i.h.bf16 %v2395_v29 }
 0xc40   :  { %v1598_v36 = vpop.xlane.xlu2 %1597 }
 0xc41   :  { %2525 = vrcp.f32 %v1598_v36  ;;  %v2277_v36 = vld [vmem:[%s3788_s16 + $0x58] sm:$0xff] }
 0xc42   :  { %2055 = vmatpush.msrb.mxu2 %v2277_v36 }
 0xc47   :  { %v2526_v19 = vpop.eup %2525 }
 0xc48   :  { %v1600_v18 = vmul.f32 %v2526_v19, %v2518_v3  ;;  %v1638_v55 = vpop.xlane.xlu2 %1637  ;;  %v2276_v19 = vld [vmem:[%s3788_s16 + $0x50] sm:$0xff] }
 0xc49   :  { %2527 = vrcp.f32 %v1638_v55  ;;  %2056 = vmatpush.msrb.mxu2 %v2276_v19  ;;  %v2410_v55 = vld [vmem:[%s3785_s15 + $0x1] ss:$0 sm:$0xff] }
 0xc4a   :  { %2244 = vmatmul.msk.f32.vlgmr.msra.gmra.mxu1 %vm289_vm11, %v1600_v18  ;;  %v2275_v18 = vld [vmem:[%s3788_s16 + $0x48] sm:$0xff] }
 0xc4b   :  { %2057 = vmatpush.msrb.mxu2 %v2275_v18 }
 0xc4e   :  { %v1848_v39 = vpop.xlane.xlu0 %1847 }
 0xc4f   :  { %v2528_v7 = vpop.eup %2527 }
 0xc50   :  { %v1640_v13 = vmul.f32 %v2528_v7, %v2520_v58  ;;  %v1764_v49 = vpop.xlane.xlu2 %1763 }
 0xc51   :  { %2529 = vrcp.f32 %v1764_v49 }
 0xc52   :  { %2243 = vmatmul.msk.f32.vlgmr.msra.gmra.mxu3 %vm289_vm11, %v1640_v13  ;;  %2531 = vrcp.f32 %v1848_v39 }
 0xc53   :  { %1925 = vmatpush.msra.mxu3 %v2262_v38  ;;  %v2274_v38 = vld [vmem:[%s3788_s16 + $0x40] sm:$0xff] }
 0xc54   :  { %2058 = vmatpush.msrb.mxu2 %v2274_v38 }
 0xc55   :  { %1926 = vmatpush.msra.mxu3 %v2261_v52 }
 0xc57   :  { %v2530_v2 = vpop.eup %2529  ;;  %1927 = vmatpush.msra.mxu3 %v2260_v53  ;;  %v2411_v53 = vld [vmem:[%s3787_s17 + $0x1] ss:$0 sm:$0xff] }
 0xc58   :  { %v1766_v11 = vmul.f32 %v2530_v2, %v2524_v14  ;;  %v2390_v27 = vpop.permute.xlu2 %2389  ;;  %v2532_v6 = vpop.eup %2531  ;;  %v2268_v14 = vld [vmem:[%s3786_s14 + $0x20] sm:$0xff] }
 0xc59   :  { %v2391_v40 = vunpack.i.l.bf16 %v2390_v27  ;;  %1928 = vmatpush.msra.mxu3 %v2259_v59  ;;  %v2392_v1 = vunpack.i.h.bf16 %v2390_v27  ;;  %v1850_v34 = vmul.f32 %v2532_v6, %v3648_v60  ;;  %v2269_v60 = vld [vmem:[%s3786_s14 + $0x28] sm:$0xff] }
 0xc5a   :  { %2251 = vmatmul.msk.f32.vlgmr.msrb.gmra.mxu3 %vm289_vm11, %v1766_v11 }
 0xc5b   :  { %1944 = vmatpush.msrb.mxu3 %v3409_v30  ;;  %1891 = vmatpush.msrb.mxu1 %v2391_v40 }
 0xc5d   :  { %1945 = vmatpush.msrb.mxu3 %v3404_v35  ;;  %1892 = vmatpush.msrb.mxu1 %v2392_v1 }
 0xc5f   :  { %1946 = vmatpush.msrb.mxu3 %v3399_v24  ;;  %1893 = vmatpush.msrb.mxu1 %v2396_v51 }
 0xc61   :  { %1947 = vmatpush.msrb.mxu3 %v3394_v21  ;;  %1894 = vmatpush.msrb.mxu1 %v2397_v10  ;;  %v2407_v21 = vld [vmem:[%s3782_s11 + $0x1] ss:$0 sm:$0xff]  ;;  %v2100_v10 = vld [vmem:[%s3795_s20 + $0x18] sm:$0xff] }
 0xc62   :  { %2258 = vmatmul.msk.f32.vlgmr.msrb.gmra.mxu1 %vm289_vm11, %v1850_v34  ;;  %2120 = vmatpush.msrb.mxu0 %v2100_v10  ;;  %v2099_v34 = vld [vmem:[%s3795_s20 + $0x10] sm:$0xff] }
 0xc63   :  { %1948 = vmatpush.msrb.mxu3 %v3389_v63  ;;  %2012 = vmatpush.msra.mxu1 %v2271_v12 }
 0xc64   :  { %2121 = vmatpush.msrb.mxu0 %v2099_v34 }
 0xc65   :  { %2013 = vmatpush.msra.mxu1 %v2270_v37 }
 0xc67   :  { %2014 = vmatpush.msra.mxu1 %v2269_v60 }
 0xc69   :  { %2015 = vmatpush.msra.mxu1 %v2268_v14 }
 0xcc7   :  { %v1729_v9 = vpop.f32.mrf.mxu1 }
 0xcd5   :  { %v1686_v30 = vpop.f32.mrf.mxu3 }
 0xcd6   :  { %v1730_v62 = vadd.f32 %v1729_v9, %v1686_v30  ;;  %v2098_v30 = vld [vmem:[%s3795_s20 + $0x8] sm:$0xff]  ;;  %v2097_v9 = vld [vmem:[%s3795_s20] sm:$0xff] }
 0xcd7   :  { %2122 = vmatpush.msrb.mxu0 %v2098_v30 }
 0xcd9   :  { %2123 = vmatpush.msrb.mxu0 %v2097_v9 }
 0xcdd   :  { %v1812_v44 = vpop.f32.mrf.mxu3 }
 0xcde   :  { %v1815_v46 = vadd.f32 %v1812_v44, %v1730_v62  ;;  %v27_v62 = vstv %s3796_s21 }
 0xcdf   :  { %v1896_v35 = vpop.f32.mrf.mxu1  ;;  %28 = vst [vmem:[#allocation2] sm:$0x1] %v27_v62 }
 0xce0   :  { %v1899_v3 = vadd.f32 %v1896_v35, %v1815_v46 }
 0xce2   :  { %2264 = vmatmul.msk.f32.vlgmr.msra.gmra.mxu3 %vm154_vm0, %v1899_v3 }
 0xce6   :  { %v2414_v12 = vld [vmem:[#allocation2] ss:$0 sm:$0xff] }
 0xcea   :  { %2265 = vmatmul.msk.f32.vlgmr.msrb.gmra.mxu3 %vm289_vm11, %v3574_v22 }
 0xd65   :  { %v1930_v24 = vpop.f32.mrf.mxu3 }
 0xd66   :  { %v1931_v48 = vadd.f32 %v2407_v21, %v1930_v24 }
 0xd6d   :  { %v1950_v26 = vpop.f32.mrf.mxu3 }
 0xd6e   :  { %v3686_v63 = vadd.f32 %v1950_v26, %v1931_v48 }
 0xd70   :  { %v1957_v25 = vsel %vm154_vm0, %v3686_v63, 0.0 }
 0xd71   :  { %1958 = vadd.xlane.f32.xlu2 %v1957_v25  ;;  %v2412_v25 = vld [vmem:[%s3793_s18] ss:$0 sm:$0xff] }
 0xde4   :  { %v1959_v56 = vpop.xlane.xlu2 %1958 }
 0xde5   :  { %v1960_v61 = vmul.f32 %v1959_v56, %v3264_v47 }
 0xde7   :  { %v1961_v58 = vsub.f32 %v3686_v63, %v1960_v61 }
 0xde9   :  { %v1962_v0 = vmul.f32 %v1961_v58, %v1961_v58 }
 0xdeb   :  { %v1963_v22 = vsel %vm154_vm0, %v1962_v0, 0.0 }
 0xdec   :  { %1964 = vadd.xlane.f32.xlu1 %v1963_v22 }
 0xe5f   :  { %v1965_v23 = vpop.xlane.xlu1 %1964 }
 0xe60   :  { %v1966_v15 = vmul.f32 %v1965_v23, %v3264_v47 }
 0xe62   :  { %v1967_v41 = vadd.f32 1e-05, %v1966_v15 }
 0xe64   :  { %2533 = vrsqrt.f32 %v1967_v41  ;;  %vm1974_vm2 = vweird.f32 %v1967_v41 }
 0xe6a   :  { %v2534_v5 = vpop.eup %2533 }
 0xe6b   :  { %v1969_v20 = vmul.f32 %v2534_v5, %v1967_v41  ;;  %vm1975_vm11 = vweird.f32 %v2534_v5 }
 0xe6c   :  { %vm1976_vm3 = vmor %vm1974_vm2, %vm1975_vm11 }
 0xe6d   :  { %v1970_v28 = vmul.f32 %v2534_v5, %v1969_v20 }
 0xe6f   :  { %v1971_v4 = vmul.f32 0.5, %v1970_v28 }
 0xe71   :  { %v1972_v8 = vsub.f32 1.5, %v1971_v4 }
 0xe73   :  { %v1973_v16 = vmul.f32 %v2534_v5, %v1972_v8 }
 0xe75   :  { %v1977_v33 = vsel %vm1976_vm3, %v2534_v5, %v1973_v16 }
 0xe76   :  { %v1978_v31 = vmul.f32 %v1977_v33, %v1961_v58 }
 0xe78   :  { %v1982_v54 = vmul.f32 %v2408_v42, %v1978_v31 }
 0xe7a   :  { %v1986_v17 = vadd.f32 %v2409_v32, %v1982_v54 }
 0xe7c   :  { %2273 = vmatmul.msk.f32.vlgmr.msra.gmra.mxu1 %vm154_vm0, %v1986_v17 }
 0xef9   :  { %v2017_v7 = vpop.f32.mrf.mxu1 }
 0xefa   :  { %v2018_v13 = vadd.f32 %v2410_v55, %v2017_v7 }
 0xefc   :  { %v2020_v49 = vmax.f32 %v2018_v13, 0.0 }
 0xefe   :  { %2022 = vrot.lane.b32.xlu0 %v2020_v49, %s2540_s2 }
 0xf70   :  { %v2023_v52 = vpop.permute.xlu0 %2022 }
 0xf71   :  { %v2025_v39 = vmul.f32 %v2023_v52, %v2018_v13 }
 0xf73   :  { %2283 = vmatmul.msk.f32.vlgmr.msrb.gmra.mxu2 %vm1272_vm14, %v2025_v39 }
 0xff6   :  { %v2060_v59 = vpop.f32.mrf.mxu2 }
 0xff7   :  { %v2061_v2 = vadd.f32 %v2411_v53, %v2060_v59 }
 0xff9   :  { %v2063_v11 = vadd.f32 %v2061_v2, %v3686_v63 }
 0xffb   :  { %v2066_v27 = vsel %vm154_vm0, %v2063_v11, 0.0 }
 0xffc   :  { %2067 = vadd.xlane.f32.xlu2 %v2066_v27 }
0x106f   :  { %v2068_v40 = vpop.xlane.xlu2 %2067 }
0x1070   :  { %v2069_v29 = vmul.f32 %v2068_v40, %v3264_v47 }
0x1072   :  { %v2070_v1 = vsub.f32 %v2063_v11, %v2069_v29 }
0x1074   :  { %v2071_v6 = vmul.f32 %v2070_v1, %v2070_v1 }
0x1076   :  { %v2072_v51 = vsel %vm154_vm0, %v2071_v6, 0.0 }
0x1077   :  { %2073 = vadd.xlane.f32.xlu0 %v2072_v51 }
0x10ea   :  { %v2074_v44 = vpop.xlane.xlu0 %2073 }
0x10eb   :  { %v2075_v46 = vmul.f32 %v2074_v44, %v3264_v47  ;;  %v2413_v47 = vld [vmem:[%s3794_s19] ss:$0 sm:$0xff] }
0x10ed   :  { %v2076_v35 = vadd.f32 1e-05, %v2075_v46 }
0x10ef   :  { %2535 = vrsqrt.f32 %v2076_v35  ;;  %vm2083_vm4 = vweird.f32 %v2076_v35 }
0x10f5   :  { %v2536_v3 = vpop.eup %2535 }
0x10f6   :  { %v2078_v24 = vmul.f32 %v2536_v3, %v2076_v35  ;;  %vm2084_vm14 = vweird.f32 %v2536_v3 }
0x10f7   :  { %vm2085_vm5 = vmor %vm2083_vm4, %vm2084_vm14 }
0x10f8   :  { %v2079_v21 = vmul.f32 %v2536_v3, %v2078_v24 }
0x10fa   :  { %v2080_v48 = vmul.f32 0.5, %v2079_v21 }
0x10fc   :  { %v2081_v26 = vsub.f32 1.5, %v2080_v48 }
0x10fe   :  { %v2082_v63 = vmul.f32 %v2536_v3, %v2081_v26 }
0x1100   :  { %v2086_v56 = vsel %vm2085_vm5, %v2536_v3, %v2082_v63 }
0x1101   :  { %v2087_v61 = vmul.f32 %v2086_v56, %v2070_v1 }
0x1103   :  { %v2091_v58 = vmul.f32 %v2412_v25, %v2087_v61 }
0x1105   :  { %v2095_v0 = vadd.f32 %v2413_v47, %v2091_v58 }
0x1107   :  { %v2096_v22 = vmax.f32 %v2095_v0, 0.0 }
0x1109   :  { %2284 = vmatmul.msk.f32.vlgmr.msrb.gmra.mxu0 %vm154_vm0, %v2096_v22 }
0x1186   :  { %v2125_v37 = vpop.f32.mrf.mxu0 }
0x1187   :  { %v2126_v60 = vadd.f32 %v2414_v12, %v2125_v37 }
0x1189   :  { %2129 = vst.msk [vmem:[%s3797_s22] sm:$0xff] %vm2128_vm6, %v2126_v60 }

</bundles_post_ra>
